<compile_context>
chip_gen: v7x
topology: tpu7x:2x2x1
jax: 0.10.0
libtpu: 0.0.40
codegen_flags: <defaults>
</compile_context>

<pallas_src>
import jax
import jax.numpy as jnp
from jax import lax
from jax.experimental import pallas as pl
from jax.experimental.pallas import tpu as pltpu

BN_EPS = 1e-5


def _rup(a, b):
    return (a + b - 1) // b * b


def block_forward(x_nchw, weight_oihw, gamma, beta, *, target_rows=1024):
    """Conv2d(3x3, pad=1, no bias) -> BatchNorm2d (batch stats) -> ReLU."""
    N, Cin, H, W = x_nchw.shape
    Cout = weight_oihw.shape[0]
    c_pad = _rup(Cout, 128)          # lane-dense output channels
    K = 9 * Cin                      # conv contraction dim (NOT padded in HBM)
    wp2 = W + 2

    # ---- tile selection: ~target_rows output pixel-rows / tile, VMEM-aware ----
    th = max(8, _rup(max(1, target_rows // max(W, 1)), 8))
    th = min(th, _rup(H, 8))

    def _vmem_bytes(t):
        win = (t + 2) * wp2 * Cin * 2                       # staging scratch
        ins = (t + 4) * wp2 * Cin * 2 * 2                   # main + halo, dbuf
        wgt = K * c_pad * 2 * 2
        outs = t * W * c_pad * 2 * 2 + 8 * c_pad * 4 * 2    # bf16 conv + stats
        live = t * W * (K * 2 * 2 + c_pad * 4 * 2)          # im2col lhs + f32 acc
        return win + ins + wgt + outs + live

    while th > 8 and _vmem_bytes(th) > 12 * 1024 * 1024:
        th -= 8

    num_tiles = -(-H // th)
    hp = num_tiles * th              # H padded up to a tile multiple
    rows_tile = th * W               # output pixel-rows per pass-1 tile
    m_tot = N * hp * W

    # ---- glue (XLA side): NCHW -> NHWC in bf16, spatial halo padding ----------
    x_nhwc = jnp.transpose(x_nchw, (0, 2, 3, 1)).astype(jnp.bfloat16)
    x_pad = jnp.pad(x_nhwc, ((0, 0), (1, 1 + hp - H), (1, 1), (0, 0)))  # (N,hp+2,W+2,Cin)

    # weights OIHW -> (kh,kw,ci,co) -> (9*Cin, Cout), lane-padded, bf16
    w_flat = jnp.transpose(weight_oihw, (2, 3, 1, 0)).reshape(K, Cout)
    w_flat = jnp.pad(w_flat, ((0, 0), (0, c_pad - Cout))).astype(jnp.bfloat16)

    # ---- pass 1: halo-blocked 3x3 conv (in-VMEM im2col + one bf16 MXU matmul
    #      per tile, f32 accumulation) + per-tile BN partial stats --------------
    def conv_kernel(xm_ref, xh_ref, w_ref, conv_ref, stats_ref, xwin_ref):
        # stage the (th+2)-row halo'd window: main rows + 2 bottom-halo rows
        xwin_ref[0:th, :, :] = xm_ref[...]
        xwin_ref[th:th + 2, :, :] = xh_ref[...]
        # gather the 9 taps in VMEM -> im2col LHS (th*W, 9*Cin), bf16
        taps = [xwin_ref[kh:kh + th, kw:kw + W, :]
                for kh in range(3) for kw in range(3)]
        lhs = jnp.concatenate(taps, axis=-1).reshape(rows_tile, K)
        conv = jnp.dot(lhs, w_ref[...], preferred_element_type=jnp.float32)
        if hp != H:
            # zero rows that only exist because H was padded up to a tile multiple
            # so they do not pollute the BN statistics
            i = pl.program_id(1)
            row = lax.broadcasted_iota(jnp.int32, (rows_tile, 1), 0) // W
            conv = jnp.where(row + i * th < H, conv, 0.0)
        conv_ref[...] = conv.astype(jnp.bfloat16)
        # BN partial stats from the f32 accumulator; rows 2..7 left unwritten
        stats_ref[0:1, :] = jnp.sum(conv, axis=0, keepdims=True)
        stats_ref[1:2, :] = jnp.sum(conv * conv, axis=0, keepdims=True)

    conv_flat, stats = pl.pallas_call(
        conv_kernel,
        out_shape=(
            jax.ShapeDtypeStruct((m_tot, c_pad), jnp.bfloat16),
            jax.ShapeDtypeStruct((N * num_tiles * 8, c_pad), jnp.float32),
        ),
        grid=(N, num_tiles),
        in_specs=[
            # main rows of the padded image for this tile: [i*th, i*th+th)
            pl.BlockSpec((None, th, wp2, Cin), lambda n, i: (n, i, 0, 0)),
            # 2-row bottom halo: [(i+1)*th, (i+1)*th+2)  (same array, 2nd arg)
            pl.BlockSpec((None, 2, wp2, Cin),
                         lambda n, i: (n, (i + 1) * (th // 2), 0, 0)),
            # tap-concatenated weights, resident across the grid
            pl.BlockSpec((K, c_pad), lambda n, i: (0, 0)),
        ],
        out_specs=(
            pl.BlockSpec((rows_tile, c_pad), lambda n, i: (n * num_tiles + i, 0)),
            pl.BlockSpec((8, c_pad), lambda n, i: (n * num_tiles + i, 0)),
        ),
        scratch_shapes=[pltpu.VMEM((th + 2, wp2, Cin), jnp.bfloat16)],
        compiler_params=pltpu.CompilerParams(
            dimension_semantics=("parallel", "parallel")),
    )(x_pad, x_pad, w_flat)

    # ---- BN statistics: tiny per-channel reduction (f32) ----------------------
    # TODO(synk): E[x^2]-E[x]^2 in one pass can lose precision for large-mean
    # activations; switch to a shifted/Welford-style combine if that matters.
    st = stats.reshape(N * num_tiles, 8, c_pad)
    count = float(N * H * W)                       # true pixel count (pads masked)
    mean = jnp.sum(st[:, 0, :], axis=0) / count
    var = jnp.maximum(jnp.sum(st[:, 1, :], axis=0) / count - mean * mean, 0.0)
    inv_std = lax.rsqrt(var + BN_EPS)

    gamma_p = jnp.pad(gamma.astype(jnp.float32), (0, c_pad - Cout))
    beta_p = jnp.pad(beta.astype(jnp.float32), (0, c_pad - Cout))
    scale = (gamma_p * inv_std).reshape(1, c_pad)
    shift = (beta_p - mean * gamma_p * inv_std).reshape(1, c_pad)

    # ---- pass 2: streaming bf16 read -> f32 affine + ReLU (large blocks) ------
    tiles_total = N * num_tiles
    max_mult = max(1, min(tiles_total // 2 if tiles_total > 1 else 1,
                          max(1, 8192 // rows_tile)))
    mult = 1
    for cand in range(max_mult, 0, -1):
        if tiles_total % cand == 0:
            mult = cand
            break
    r2 = rows_tile * mult
    grid2 = tiles_total // mult

    def bn_relu_kernel(conv_ref, scale_ref, shift_ref, o_ref):
        y = conv_ref[...].astype(jnp.float32) * scale_ref[...] + shift_ref[...]
        o_ref[...] = jnp.maximum(y, 0.0)

    y_flat = pl.pallas_call(
        bn_relu_kernel,
        out_shape=jax.ShapeDtypeStruct((m_tot, c_pad), jnp.float32),
        grid=(grid2,),
        in_specs=[
            pl.BlockSpec((r2, c_pad), lambda i: (i, 0)),
            pl.BlockSpec((1, c_pad), lambda i: (0, 0)),
            pl.BlockSpec((1, c_pad), lambda i: (0, 0)),
        ],
        out_specs=pl.BlockSpec((r2, c_pad), lambda i: (i, 0)),
        compiler_params=pltpu.CompilerParams(dimension_semantics=("parallel",)),
    )(conv_flat, scale, shift)

    y = y_flat.reshape(N, hp, W, c_pad)[:, :H, :, :Cout]
    return jnp.transpose(y, (0, 3, 1, 2))          # NHWC -> NCHW


if __name__ == "__main__":
    key = jax.random.PRNGKey(0)
    k_x, k_w, k_g, k_b = jax.random.split(key, 4)

    # Small shapes consistent with the module: block(inp=4, out=8), 16x16 spatial
    N, Cin, H, W = 2, 4, 16, 16
    Cout = 8

    x = jax.random.normal(k_x, (N, Cin, H, W), dtype=jnp.float32)
    weight = jax.random.normal(k_w, (Cout, Cin, 3, 3), dtype=jnp.float32) * 0.1
    gamma = 1.0 + 0.1 * jax.random.normal(k_g, (Cout,), dtype=jnp.float32)
    beta = 0.1 * jax.random.normal(k_b, (Cout,), dtype=jnp.float32)

    out = jax.jit(block_forward)(x, weight, gamma, beta)
    jax.block_until_ready(out)

    assert out.shape == (N, Cout, H, W), out.shape
    assert bool(jnp.all(out >= 0.0))               # ReLU sanity

    # Pure-JAX f32 reference: conv -> training-mode BN (batch stats) -> ReLU
    x_nhwc = jnp.transpose(x, (0, 2, 3, 1))
    w_hwio = jnp.transpose(weight, (2, 3, 1, 0))
    conv_ref = lax.conv_general_dilated(
        x_nhwc, w_hwio, window_strides=(1, 1), padding=((1, 1), (1, 1)),
        dimension_numbers=("NHWC", "HWIO", "NHWC"))
    mu = jnp.mean(conv_ref, axis=(0, 1, 2))
    var = jnp.mean((conv_ref - mu) ** 2, axis=(0, 1, 2))
    ref = jnp.maximum((conv_ref - mu) * lax.rsqrt(var + BN_EPS) * gamma + beta, 0.0)
    ref = jnp.transpose(ref, (0, 3, 1, 2))
    err = float(jnp.max(jnp.abs(out - ref)))
    # bf16 MXU inputs -> ~0.3% relative error on the conv before normalization
    assert err < 5e-2, f"max abs err vs f32 reference = {err}"

    print("KERNEL_OK")
</pallas_src>

<mosaic_0001>
module attributes {stable_mosaic.version = 11 : i64} {
  func.func @conv_kernel(%arg0: i32, %arg1: i32, %arg2: memref<1x16x18x4xbf16, #tpu.memory_space<vmem>>, %arg3: memref<1x2x18x4xbf16, #tpu.memory_space<vmem>>, %arg4: memref<36x128xbf16, #tpu.memory_space<vmem>>, %arg5: memref<256x128xbf16, #tpu.memory_space<vmem>>, %arg6: memref<8x128xf32, #tpu.memory_space<vmem>>, %arg7: memref<18x18x4xbf16, #tpu.memory_space<vmem>>) attributes {dimension_semantics = [#tpu.dimension_semantics<parallel>, #tpu.dimension_semantics<parallel>], iteration_bounds = array<i64: 2, 1>, scalar_prefetch = 0 : i64, scratch_operands = 1 : i64, tpu.core_type = #tpu.core_type<tc>, window_params = [{transform_indices = @transform_0, window_bounds = array<i64: 1, 16, 18, 4>}, {transform_indices = @transform_1, window_bounds = array<i64: 1, 2, 18, 4>}, {pipeline_mode = #tpu.pipeline_mode<synchronous>, transform_indices = @transform_2, window_bounds = array<i64: 36, 128>}, {transform_indices = @transform_3, window_bounds = array<i64: 256, 128>}, {transform_indices = @transform_4, window_bounds = array<i64: 8, 128>}]} {
    %c0 = arith.constant 0 : index
    %c0_0 = arith.constant 0 : index
    %c0_1 = arith.constant 0 : index
    %c0_2 = arith.constant 0 : index
    %0 = vector.load %arg2[%c0, %c0_0, %c0_1, %c0_2] : memref<1x16x18x4xbf16, #tpu.memory_space<vmem>>, vector<1x16x18x4xbf16>
    %1 = vector.shape_cast %0 : vector<1x16x18x4xbf16> to vector<16x18x4xbf16>
    %c0_3 = arith.constant 0 : index
    %c0_4 = arith.constant 0 : index
    %c0_5 = arith.constant 0 : index
    %2 = vector.load %arg7[%c0_3, %c0_4, %c0_5] : memref<18x18x4xbf16, #tpu.memory_space<vmem>>, vector<16x18x4xbf16>
    tpu.vector_store %arg7[%c0_3, %c0_4, %c0_5], %1 {strides = array<i32>} : memref<18x18x4xbf16, #tpu.memory_space<vmem>>, vector<16x18x4xbf16>,
    %c0_6 = arith.constant 0 : index
    %c0_7 = arith.constant 0 : index
    %c0_8 = arith.constant 0 : index
    %c0_9 = arith.constant 0 : index
    %3 = vector.load %arg3[%c0_6, %c0_7, %c0_8, %c0_9] : memref<1x2x18x4xbf16, #tpu.memory_space<vmem>>, vector<1x2x18x4xbf16>
    %4 = vector.shape_cast %3 : vector<1x2x18x4xbf16> to vector<2x18x4xbf16>
    %c16 = arith.constant 16 : index
    %c0_10 = arith.constant 0 : index
    %c0_11 = arith.constant 0 : index
    %5 = vector.load %arg7[%c16, %c0_10, %c0_11] : memref<18x18x4xbf16, #tpu.memory_space<vmem>>, vector<2x18x4xbf16>
    tpu.vector_store %arg7[%c16, %c0_10, %c0_11], %4 {strides = array<i32>} : memref<18x18x4xbf16, #tpu.memory_space<vmem>>, vector<2x18x4xbf16>,
    %c0_12 = arith.constant 0 : index
    %c0_13 = arith.constant 0 : index
    %c0_14 = arith.constant 0 : index
    %6 = vector.load %arg7[%c0_12, %c0_13, %c0_14] : memref<18x18x4xbf16, #tpu.memory_space<vmem>>, vector<16x16x4xbf16>
    %c0_15 = arith.constant 0 : index
    %c1 = arith.constant 1 : index
    %c0_16 = arith.constant 0 : index
    %7 = vector.load %arg7[%c0_15, %c1, %c0_16] : memref<18x18x4xbf16, #tpu.memory_space<vmem>>, vector<16x16x4xbf16>
    %c0_17 = arith.constant 0 : index
    %c2 = arith.constant 2 : index
    %c0_18 = arith.constant 0 : index
    %8 = vector.load %arg7[%c0_17, %c2, %c0_18] : memref<18x18x4xbf16, #tpu.memory_space<vmem>>, vector<16x16x4xbf16>
    %c1_19 = arith.constant 1 : index
    %c0_20 = arith.constant 0 : index
    %c0_21 = arith.constant 0 : index
    %9 = vector.load %arg7[%c1_19, %c0_20, %c0_21] : memref<18x18x4xbf16, #tpu.memory_space<vmem>>, vector<16x16x4xbf16>
    %c1_22 = arith.constant 1 : index
    %c1_23 = arith.constant 1 : index
    %c0_24 = arith.constant 0 : index
    %10 = vector.load %arg7[%c1_22, %c1_23, %c0_24] : memref<18x18x4xbf16, #tpu.memory_space<vmem>>, vector<16x16x4xbf16>
    %c1_25 = arith.constant 1 : index
    %c2_26 = arith.constant 2 : index
    %c0_27 = arith.constant 0 : index
    %11 = vector.load %arg7[%c1_25, %c2_26, %c0_27] : memref<18x18x4xbf16, #tpu.memory_space<vmem>>, vector<16x16x4xbf16>
    %c2_28 = arith.constant 2 : index
    %c0_29 = arith.constant 0 : index
    %c0_30 = arith.constant 0 : index
    %12 = vector.load %arg7[%c2_28, %c0_29, %c0_30] : memref<18x18x4xbf16, #tpu.memory_space<vmem>>, vector<16x16x4xbf16>
    %c2_31 = arith.constant 2 : index
    %c1_32 = arith.constant 1 : index
    %c0_33 = arith.constant 0 : index
    %13 = vector.load %arg7[%c2_31, %c1_32, %c0_33] : memref<18x18x4xbf16, #tpu.memory_space<vmem>>, vector<16x16x4xbf16>
    %c2_34 = arith.constant 2 : index
    %c2_35 = arith.constant 2 : index
    %c0_36 = arith.constant 0 : index
    %14 = vector.load %arg7[%c2_34, %c2_35, %c0_36] : memref<18x18x4xbf16, #tpu.memory_space<vmem>>, vector<16x16x4xbf16>
    %15 = tpu.concatenate %6, %7, %8, %9, %10, %11, %12, %13, %14 in 2 : vector<16x16x4xbf16>, vector<16x16x4xbf16>, vector<16x16x4xbf16>, vector<16x16x4xbf16>, vector<16x16x4xbf16>, vector<16x16x4xbf16>, vector<16x16x4xbf16>, vector<16x16x4xbf16>, vector<16x16x4xbf16> -> vector<16x16x36xbf16>
    %16 = vector.shape_cast %15 : vector<16x16x36xbf16> to vector<256x36xbf16>
    %c0_37 = arith.constant 0 : index
    %c0_38 = arith.constant 0 : index
    %17 = vector.load %arg4[%c0_37, %c0_38] : memref<36x128xbf16, #tpu.memory_space<vmem>>, vector<36x128xbf16>
    %cst = arith.constant dense<0.000000e+00> : vector<256x128xf32>
    %18 = tpu.matmul %16, %17, %cst {dimension_numbers = #tpu.dot_dimension_numbers<[1], [0], [0], [1], [0, 0, 1, 1], [], []>} : vector<256x36xbf16>, vector<36x128xbf16>, vector<256x128xf32> -> vector<256x128xf32>
    %19 = arith.truncf %18 : vector<256x128xf32> to vector<256x128xbf16>
    %c0_39 = arith.constant 0 : index
    %c0_40 = arith.constant 0 : index
    %20 = vector.load %arg5[%c0_39, %c0_40] : memref<256x128xbf16, #tpu.memory_space<vmem>>, vector<256x128xbf16>
    tpu.vector_store %arg5[%c0_39, %c0_40], %19 {strides = array<i32>} : memref<256x128xbf16, #tpu.memory_space<vmem>>, vector<256x128xbf16>,
    %cst_41 = arith.constant dense<0.000000e+00> : vector<128xf32>
    %21 = vector.multi_reduction <add>, %18, %cst_41 [0] : vector<256x128xf32> to vector<128xf32>
    %22 = vector.shape_cast %21 : vector<128xf32> to vector<1x128xf32>
    %c0_42 = arith.constant 0 : index
    %c0_43 = arith.constant 0 : index
    %23 = vector.load %arg6[%c0_42, %c0_43] : memref<8x128xf32, #tpu.memory_space<vmem>>, vector<1x128xf32>
    tpu.vector_store %arg6[%c0_42, %c0_43], %22 {strides = array<i32>} : memref<8x128xf32, #tpu.memory_space<vmem>>, vector<1x128xf32>,
    %24 = arith.mulf %18, %18 : vector<256x128xf32>
    %cst_44 = arith.constant dense<0.000000e+00> : vector<128xf32>
    %25 = vector.multi_reduction <add>, %24, %cst_44 [0] : vector<256x128xf32> to vector<128xf32>
    %26 = vector.shape_cast %25 : vector<128xf32> to vector<1x128xf32>
    %c1_45 = arith.constant 1 : index
    %c0_46 = arith.constant 0 : index
    %27 = vector.load %arg6[%c1_45, %c0_46] : memref<8x128xf32, #tpu.memory_space<vmem>>, vector<1x128xf32>
    tpu.vector_store %arg6[%c1_45, %c0_46], %26 {strides = array<i32>} : memref<8x128xf32, #tpu.memory_space<vmem>>, vector<1x128xf32>,
    return
  }
  func.func @transform_0(%arg0: i32, %arg1: i32) -> (i32, i32, i32, i32) {
    %c0_i32 = arith.constant 0 : i32
    %c0_i32_0 = arith.constant 0 : i32
    %c0_i32_1 = arith.constant 0 : i32
    return %arg0, %arg1, %c0_i32, %c0_i32_0 : i32, i32, i32, i32
  }
  func.func @transform_1(%arg0: i32, %arg1: i32) -> (i32, i32, i32, i32) {
    %c1_i32 = arith.constant 1 : i32
    %0 = arith.addi %arg1, %c1_i32 : i32
    %c8_i32 = arith.constant 8 : i32
    %1 = arith.muli %0, %c8_i32 : i32
    %c0_i32 = arith.constant 0 : i32
    %c0_i32_0 = arith.constant 0 : i32
    %c0_i32_1 = arith.constant 0 : i32
    return %arg0, %1, %c0_i32, %c0_i32_0 : i32, i32, i32, i32
  }
  func.func @transform_2(%arg0: i32, %arg1: i32) -> (i32, i32) {
    %c0_i32 = arith.constant 0 : i32
    %c0_i32_0 = arith.constant 0 : i32
    %c0_i32_1 = arith.constant 0 : i32
    return %c0_i32, %c0_i32_0 : i32, i32
  }
  func.func @transform_3(%arg0: i32, %arg1: i32) -> (i32, i32) {
    %c1_i32 = arith.constant 1 : i32
    %0 = arith.muli %arg0, %c1_i32 : i32
    %1 = arith.addi %0, %arg1 : i32
    %c0_i32 = arith.constant 0 : i32
    %c0_i32_0 = arith.constant 0 : i32
    return %1, %c0_i32 : i32, i32
  }
  func.func @transform_4(%arg0: i32, %arg1: i32) -> (i32, i32) {
    %c1_i32 = arith.constant 1 : i32
    %0 = arith.muli %arg0, %c1_i32 : i32
    %1 = arith.addi %0, %arg1 : i32
    %c0_i32 = arith.constant 0 : i32
    %c0_i32_0 = arith.constant 0 : i32
    return %1, %c0_i32 : i32, i32
  }
}

module attributes {stable_mosaic.version = 11 : i64} {
  func.func @bn_relu_kernel(%arg0: i32, %arg1: memref<256x128xbf16, #tpu.memory_space<vmem>>, %arg2: memref<1x128xf32, #tpu.memory_space<vmem>>, %arg3: memref<1x128xf32, #tpu.memory_space<vmem>>, %arg4: memref<256x128xf32, #tpu.memory_space<vmem>>) attributes {dimension_semantics = [#tpu.dimension_semantics<parallel>], iteration_bounds = array<i64: 2>, scalar_prefetch = 0 : i64, scratch_operands = 0 : i64, tpu.core_type = #tpu.core_type<tc>, window_params = [{transform_indices = @transform_0, window_bounds = array<i64: 256, 128>}, {pipeline_mode = #tpu.pipeline_mode<synchronous>, transform_indices = @transform_1, window_bounds = array<i64: 1, 128>}, {pipeline_mode = #tpu.pipeline_mode<synchronous>, transform_indices = @transform_2, window_bounds = array<i64: 1, 128>}, {transform_indices = @transform_3, window_bounds = array<i64: 256, 128>}]} {
    %c0 = arith.constant 0 : index
    %c0_0 = arith.constant 0 : index
    %0 = vector.load %arg1[%c0, %c0_0] : memref<256x128xbf16, #tpu.memory_space<vmem>>, vector<256x128xbf16>
    %1 = arith.extf %0 : vector<256x128xbf16> to vector<256x128xf32>
    %c0_1 = arith.constant 0 : index
    %c0_2 = arith.constant 0 : index
    %2 = vector.load %arg2[%c0_1, %c0_2] : memref<1x128xf32, #tpu.memory_space<vmem>>, vector<1x128xf32>
    %3 = vector.broadcast %2 : vector<1x128xf32> to vector<256x128xf32>
    %4 = arith.mulf %1, %3 : vector<256x128xf32>
    %c0_3 = arith.constant 0 : index
    %c0_4 = arith.constant 0 : index
    %5 = vector.load %arg3[%c0_3, %c0_4] : memref<1x128xf32, #tpu.memory_space<vmem>>, vector<1x128xf32>
    %6 = vector.broadcast %5 : vector<1x128xf32> to vector<256x128xf32>
    %7 = arith.addf %4, %6 : vector<256x128xf32>
    %cst = arith.constant 0.000000e+00 : f32
    %8 = vector.broadcast %cst : f32 to vector<256x128xf32>
    %9 = arith.maximumf %7, %8 : vector<256x128xf32>
    %c0_5 = arith.constant 0 : index
    %c0_6 = arith.constant 0 : index
    %10 = vector.load %arg4[%c0_5, %c0_6] : memref<256x128xf32, #tpu.memory_space<vmem>>, vector<256x128xf32>
    tpu.vector_store %arg4[%c0_5, %c0_6], %9 {strides = array<i32>} : memref<256x128xf32, #tpu.memory_space<vmem>>, vector<256x128xf32>,
    return
  }
  func.func @transform_0(%arg0: i32) -> (i32, i32) {
    %c0_i32 = arith.constant 0 : i32
    %c0_i32_0 = arith.constant 0 : i32
    return %arg0, %c0_i32 : i32, i32
  }
  func.func @transform_1(%arg0: i32) -> (i32, i32) {
    %c0_i32 = arith.constant 0 : i32
    %c0_i32_0 = arith.constant 0 : i32
    %c0_i32_1 = arith.constant 0 : i32
    return %c0_i32, %c0_i32_0 : i32, i32
  }
  func.func @transform_2(%arg0: i32) -> (i32, i32) {
    %c0_i32 = arith.constant 0 : i32
    %c0_i32_0 = arith.constant 0 : i32
    %c0_i32_1 = arith.constant 0 : i32
    return %c0_i32, %c0_i32_0 : i32, i32
  }
  func.func @transform_3(%arg0: i32) -> (i32, i32) {
    %c0_i32 = arith.constant 0 : i32
    %c0_i32_0 = arith.constant 0 : i32
    return %arg0, %c0_i32 : i32, i32
  }
}

</mosaic_0001>

<bundles_post_ra>
// kernel: block_forward.3
= control target key start
LH: loop header
LB: loop body
LE: loop exit
PB: predicated region body
PF: predicated region fallthrough
CT: control target
= control target key end

     0   :  { %s564_s12 = smov 0   ;;  %s711_s0 = inlined_call_operand.vmem [shape: bf16[512,128], index: 0, kind: input, shape index: {}]   ;;  %s712_s1 = inlined_call_operand.vmem [shape: f32[1,128], index: 1, kind: input, shape index: {}]   ;;  %s713_s2 = inlined_call_operand.vmem [shape: f32[1,128], index: 2, kind: input, shape index: {}]   ;;  %s714_s3 = inlined_call_operand.vmem [shape: f32[512,128], index: 3, kind: output, shape index: {}]  }
   0x1 LB: > { %s436_s13 = sadd.s32 4294967295, %s542_s12   ;;  %p440_p0 = scmp.ge.s32.totalorder %s542_s12, 1  ;;  %s542_s12 = sphi %s564_s12, %s13_s12  }
   0x2   : > { %p138_p1 = scmp.lt.s32.totalorder %s542_s12, 3 }
   0x4   : > { %p139_p2 = pnand %p440_p0, %p138_p1 }
   0x5   : > { %s441_s14 = sshll.u32 (!%p139_p2), %s436_s13, 5  ;;  %v583_v0 = vld [vmem:[%s712_s1] ss:$0 sm:$0xff] (!%p139_p2) }
   0x6   : > { %142 = sbr.rel (%p139_p2) target bundleno = 53 (0x35), region = 32  ;;  %p163_p3 = scmp.lt.s32.totalorder (!%p139_p2), %s441_s14, 63  ;;  %v592_v9 = vld [vmem:[%s713_s2] ss:$0 sm:$0xff] (!%p139_p2) }
   0xd   : > { %s716_s14 = smov (!%p163_p3, %s441_s14), 63 }
   0xe   : > { %s442_s15 = sshll.u32 %s716_s14, 2  ;;  %s444_s23 = sshll.u32 %s716_s14, 3 }
   0xf   : > { %s578_s18 = scalar_lea.vmem %s711_s0, %s442_s15  ;;  %s610_s26 = scalar_lea.vmem %s714_s3, %s444_s23 }
  0x10   : > { %v450_v1 = vld [vmem:[%s578_s18] sm:$0xff]   ;;  %v513_v2 = vld [vmem:[%s578_s18 + $0x8] sm:$0xff]   ;;  %v514_v3 = vld [vmem:[%s578_s18 + $0x10] sm:$0xff]  }
  0x11   : > { %v451_v4 = vunpack.c.l.bf16 %v450_v1  ;;  %v452_v5 = vunpack.c.h.bf16 %v450_v1  ;;  %v455_v6 = vunpack.c.l.bf16 %v513_v2  ;;  %v456_v7 = vunpack.c.h.bf16 %v513_v2  ;;  %v515_v8 = vld [vmem:[%s578_s18 + $0x18] sm:$0xff]   ;;  %v516_v30 = vld [vmem:[%s578_s18 + $0x20] sm:$0xff]   ;;  %v517_v31 = vld [vmem:[%s578_s18 + $0x28] sm:$0xff]  }
  0x12   : > { %v459_v10 = vunpack.c.l.bf16 %v514_v3  ;;  %v460_v11 = vunpack.c.h.bf16 %v514_v3  ;;  %v463_v12 = vunpack.c.l.bf16 %v515_v8  ;;  %v464_v13 = vunpack.c.h.bf16 %v515_v8  ;;  %v518_v36 = vld [vmem:[%s578_s18 + $0x30] sm:$0xff]   ;;  %v519_v37 = vld [vmem:[%s578_s18 + $0x38] sm:$0xff]   ;;  %v520_v3 = vld [vmem:[%s578_s18 + $0x40] sm:$0xff]  }
  0x13   : > { %v245_v14 = vmul.f32 %v451_v4, %v583_v0  ;;  %v246_v15 = vmul.f32 %v452_v5, %v583_v0  ;;  %v247_v16 = vmul.f32 %v455_v6, %v583_v0  ;;  %v248_v17 = vmul.f32 %v456_v7, %v583_v0  ;;  %v521_v4 = vld [vmem:[%s578_s18 + $0x48] sm:$0xff]  }
  0x14   : > { %v249_v18 = vmul.f32 %v459_v10, %v583_v0  ;;  %v250_v19 = vmul.f32 %v460_v11, %v583_v0  ;;  %v251_v20 = vmul.f32 %v463_v12, %v583_v0  ;;  %v252_v21 = vmul.f32 %v464_v13, %v583_v0  ;;  %v522_v10 = vld [vmem:[%s578_s18 + $0x50] sm:$0xff]   ;;  %v523_v11 = vld [vmem:[%s578_s18 + $0x58] sm:$0xff]  }
  0x15   : > { %v284_v22 = vadd.f32 %v592_v9, %v245_v14  ;;  %v285_v23 = vadd.f32 %v592_v9, %v246_v15  ;;  %v286_v24 = vadd.f32 %v592_v9, %v247_v16  ;;  %v287_v25 = vadd.f32 %v592_v9, %v248_v17 }
  0x16   : > { %v288_v26 = vadd.f32 %v592_v9, %v249_v18  ;;  %v289_v27 = vadd.f32 %v592_v9, %v250_v19  ;;  %v290_v28 = vadd.f32 %v592_v9, %v251_v20  ;;  %v291_v29 = vadd.f32 %v592_v9, %v252_v21 }
  0x17   : > { %v316_v32 = vmax.f32 %v284_v22, 0.0  ;;  %v317_v33 = vmax.f32 %v285_v23, 0.0  ;;  %v318_v34 = vmax.f32 %v286_v24, 0.0  ;;  %v319_v35 = vmax.f32 %v287_v25, 0.0 }
  0x18   : > { %v320_v38 = vmax.f32 %v288_v26, 0.0  ;;  %v321_v39 = vmax.f32 %v289_v27, 0.0  ;;  %v322_v40 = vmax.f32 %v290_v28, 0.0  ;;  %v323_v41 = vmax.f32 %v291_v29, 0.0 }
  0x19   : > { %348 = vst [vmem:[%s610_s26] sm:$0xff] %v316_v32  ;;  %349 = vst [vmem:[%s610_s26 + $0x8] sm:$0xff] %v317_v33  ;;  %v467_v42 = vunpack.c.l.bf16 %v516_v30  ;;  %v468_v43 = vunpack.c.h.bf16 %v516_v30  ;;  %v471_v44 = vunpack.c.l.bf16 %v517_v31  ;;  %v472_v45 = vunpack.c.h.bf16 %v517_v31 }
  0x1a   : > { %350 = vst [vmem:[%s610_s26 + $0x10] sm:$0xff] %v318_v34  ;;  %351 = vst [vmem:[%s610_s26 + $0x18] sm:$0xff] %v319_v35  ;;  %v475_v46 = vunpack.c.l.bf16 %v518_v36  ;;  %v476_v47 = vunpack.c.h.bf16 %v518_v36  ;;  %v479_v48 = vunpack.c.l.bf16 %v519_v37  ;;  %v480_v49 = vunpack.c.h.bf16 %v519_v37 }
  0x1b   : > { %352 = vst [vmem:[%s610_s26 + $0x20] sm:$0xff] %v320_v38  ;;  %353 = vst [vmem:[%s610_s26 + $0x28] sm:$0xff] %v321_v39  ;;  %v253_v50 = vmul.f32 %v467_v42, %v583_v0  ;;  %v254_v51 = vmul.f32 %v468_v43, %v583_v0  ;;  %v255_v52 = vmul.f32 %v471_v44, %v583_v0  ;;  %v483_v16 = vunpack.c.l.bf16 %v520_v3 }
  0x1c   : > { %354 = vst [vmem:[%s610_s26 + $0x30] sm:$0xff] %v322_v40  ;;  %355 = vst [vmem:[%s610_s26 + $0x38] sm:$0xff] %v323_v41  ;;  %v256_v53 = vmul.f32 %v472_v45, %v583_v0  ;;  %v257_v54 = vmul.f32 %v475_v46, %v583_v0  ;;  %v258_v55 = vmul.f32 %v476_v47, %v583_v0  ;;  %v484_v17 = vunpack.c.h.bf16 %v520_v3  ;;  %v524_v40 = vld [vmem:[%s578_s18 + $0x60] sm:$0xff]   ;;  %v525_v41 = vld [vmem:[%s578_s18 + $0x68] sm:$0xff]  }
  0x1d   : > { %v259_v56 = vmul.f32 %v479_v48, %v583_v0  ;;  %v260_v57 = vmul.f32 %v480_v49, %v583_v0  ;;  %v292_v58 = vadd.f32 %v592_v9, %v253_v50  ;;  %v293_v59 = vadd.f32 %v592_v9, %v254_v51  ;;  %v526_v46 = vld [vmem:[%s578_s18 + $0x70] sm:$0xff]   ;;  %v527_v47 = vld [vmem:[%s578_s18 + $0x78] sm:$0xff]  }
  0x1e   : > { %v294_v60 = vadd.f32 %v592_v9, %v255_v52  ;;  %v295_v61 = vadd.f32 %v592_v9, %v256_v53  ;;  %v296_v62 = vadd.f32 %v592_v9, %v257_v54  ;;  %v297_v63 = vadd.f32 %v592_v9, %v258_v55 }
  0x1f   : > { %v298_v1 = vadd.f32 %v592_v9, %v259_v56  ;;  %v299_v2 = vadd.f32 %v592_v9, %v260_v57  ;;  %v324_v5 = vmax.f32 %v292_v58, 0.0  ;;  %v325_v6 = vmax.f32 %v293_v59, 0.0 }
  0x20   : > { %v326_v7 = vmax.f32 %v294_v60, 0.0  ;;  %v327_v8 = vmax.f32 %v295_v61, 0.0  ;;  %v328_v12 = vmax.f32 %v296_v62, 0.0  ;;  %v329_v13 = vmax.f32 %v297_v63, 0.0 }
  0x21   : > { %v330_v14 = vmax.f32 %v298_v1, 0.0  ;;  %v331_v15 = vmax.f32 %v299_v2, 0.0  ;;  %356 = vst [vmem:[%s610_s26 + $0x40] sm:$0xff] %v324_v5  ;;  %357 = vst [vmem:[%s610_s26 + $0x48] sm:$0xff] %v325_v6  ;;  %v487_v18 = vunpack.c.l.bf16 %v521_v4  ;;  %v488_v19 = vunpack.c.h.bf16 %v521_v4 }
  0x22   : > { %358 = vst [vmem:[%s610_s26 + $0x50] sm:$0xff] %v326_v7  ;;  %359 = vst [vmem:[%s610_s26 + $0x58] sm:$0xff] %v327_v8  ;;  %v491_v20 = vunpack.c.l.bf16 %v522_v10  ;;  %v492_v21 = vunpack.c.h.bf16 %v522_v10  ;;  %v495_v22 = vunpack.c.l.bf16 %v523_v11  ;;  %v496_v23 = vunpack.c.h.bf16 %v523_v11 }
  0x23   : > { %360 = vst [vmem:[%s610_s26 + $0x60] sm:$0xff] %v328_v12  ;;  %361 = vst [vmem:[%s610_s26 + $0x68] sm:$0xff] %v329_v13  ;;  %v261_v24 = vmul.f32 %v483_v16, %v583_v0  ;;  %v262_v25 = vmul.f32 %v484_v17, %v583_v0  ;;  %v263_v26 = vmul.f32 %v487_v18, %v583_v0  ;;  %v499_v52 = vunpack.c.l.bf16 %v524_v40 }
  0x24   : > { %362 = vst [vmem:[%s610_s26 + $0x70] sm:$0xff] %v330_v14  ;;  %363 = vst [vmem:[%s610_s26 + $0x78] sm:$0xff] %v331_v15  ;;  %v264_v27 = vmul.f32 %v488_v19, %v583_v0  ;;  %v265_v28 = vmul.f32 %v491_v20, %v583_v0  ;;  %v266_v29 = vmul.f32 %v492_v21, %v583_v0  ;;  %v500_v53 = vunpack.c.h.bf16 %v524_v40 }
  0x25   : > { %v267_v30 = vmul.f32 %v495_v22, %v583_v0  ;;  %v268_v31 = vmul.f32 %v496_v23, %v583_v0  ;;  %v300_v32 = vadd.f32 %v592_v9, %v261_v24  ;;  %v301_v33 = vadd.f32 %v592_v9, %v262_v25 }
  0x26   : > { %v302_v34 = vadd.f32 %v592_v9, %v263_v26  ;;  %v303_v35 = vadd.f32 %v592_v9, %v264_v27  ;;  %v304_v36 = vadd.f32 %v592_v9, %v265_v28  ;;  %v305_v37 = vadd.f32 %v592_v9, %v266_v29 }
  0x27   : > { %v306_v38 = vadd.f32 %v592_v9, %v267_v30  ;;  %v307_v39 = vadd.f32 %v592_v9, %v268_v31  ;;  %v332_v42 = vmax.f32 %v300_v32, 0.0  ;;  %v333_v43 = vmax.f32 %v301_v33, 0.0 }
  0x28   : > { %v334_v44 = vmax.f32 %v302_v34, 0.0  ;;  %v335_v45 = vmax.f32 %v303_v35, 0.0  ;;  %v336_v48 = vmax.f32 %v304_v36, 0.0  ;;  %v337_v49 = vmax.f32 %v305_v37, 0.0 }
  0x29   : > { %v338_v50 = vmax.f32 %v306_v38, 0.0  ;;  %v339_v51 = vmax.f32 %v307_v39, 0.0  ;;  %364 = vst [vmem:[%s610_s26 + $0x80] sm:$0xff] %v332_v42  ;;  %365 = vst [vmem:[%s610_s26 + $0x88] sm:$0xff] %v333_v43  ;;  %v503_v54 = vunpack.c.l.bf16 %v525_v41  ;;  %v504_v55 = vunpack.c.h.bf16 %v525_v41 }
  0x2a   : > { %366 = vst [vmem:[%s610_s26 + $0x90] sm:$0xff] %v334_v44  ;;  %367 = vst [vmem:[%s610_s26 + $0x98] sm:$0xff] %v335_v45  ;;  %v507_v56 = vunpack.c.l.bf16 %v526_v46  ;;  %v508_v57 = vunpack.c.h.bf16 %v526_v46  ;;  %v511_v58 = vunpack.c.l.bf16 %v527_v47  ;;  %v512_v59 = vunpack.c.h.bf16 %v527_v47 }
  0x2b   : > { %368 = vst [vmem:[%s610_s26 + $0xa0] sm:$0xff] %v336_v48  ;;  %369 = vst [vmem:[%s610_s26 + $0xa8] sm:$0xff] %v337_v49  ;;  %v269_v60 = vmul.f32 %v499_v52, %v583_v0  ;;  %v270_v61 = vmul.f32 %v500_v53, %v583_v0  ;;  %v271_v62 = vmul.f32 %v503_v54, %v583_v0 }
  0x2c   : > { %370 = vst [vmem:[%s610_s26 + $0xb0] sm:$0xff] %v338_v50  ;;  %371 = vst [vmem:[%s610_s26 + $0xb8] sm:$0xff] %v339_v51  ;;  %v272_v63 = vmul.f32 %v504_v55, %v583_v0  ;;  %v273_v1 = vmul.f32 %v507_v56, %v583_v0  ;;  %v274_v2 = vmul.f32 %v508_v57, %v583_v0 }
  0x2d   : > { %v275_v3 = vmul.f32 %v511_v58, %v583_v0  ;;  %v276_v4 = vmul.f32 %v512_v59, %v583_v0  ;;  %v308_v5 = vadd.f32 %v592_v9, %v269_v60  ;;  %v309_v6 = vadd.f32 %v592_v9, %v270_v61 }
  0x2e   : > { %v310_v7 = vadd.f32 %v592_v9, %v271_v62  ;;  %v311_v8 = vadd.f32 %v592_v9, %v272_v63  ;;  %v312_v10 = vadd.f32 %v592_v9, %v273_v1  ;;  %v313_v11 = vadd.f32 %v592_v9, %v274_v2 }
  0x2f   : > { %v314_v0 = vadd.f32 %v592_v9, %v275_v3  ;;  %v315_v12 = vadd.f32 %v592_v9, %v276_v4  ;;  %v340_v13 = vmax.f32 %v308_v5, 0.0  ;;  %v341_v14 = vmax.f32 %v309_v6, 0.0 }
  0x30   : > { %v342_v15 = vmax.f32 %v310_v7, 0.0  ;;  %v343_v16 = vmax.f32 %v311_v8, 0.0  ;;  %v344_v17 = vmax.f32 %v312_v10, 0.0  ;;  %v345_v18 = vmax.f32 %v313_v11, 0.0 }
  0x31   : > { %v346_v19 = vmax.f32 %v314_v0, 0.0  ;;  %v347_v20 = vmax.f32 %v315_v12, 0.0  ;;  %372 = vst [vmem:[%s610_s26 + $0xc0] sm:$0xff] %v340_v13  ;;  %373 = vst [vmem:[%s610_s26 + $0xc8] sm:$0xff] %v341_v14 }
  0x32   : > { %374 = vst [vmem:[%s610_s26 + $0xd0] sm:$0xff] %v342_v15  ;;  %375 = vst [vmem:[%s610_s26 + $0xd8] sm:$0xff] %v343_v16 }
  0x33   : > { %376 = vst [vmem:[%s610_s26 + $0xe0] sm:$0xff] %v344_v17  ;;  %377 = vst [vmem:[%s610_s26 + $0xe8] sm:$0xff] %v345_v18 }
  0x34   : > { %378 = vst [vmem:[%s610_s26 + $0xf0] sm:$0xff] %v346_v19  ;;  %379 = vst [vmem:[%s610_s26 + $0xf8] sm:$0xff] %v347_v20 }
  0x35 PF: > { %s13_s12 = sadd.s32 1, %s542_s12  }
  0x36   : > { %p10_p4 = scmp.ge.s32.totalorder %s13_s12, 4  }
  0x38   :  { %12 = sbr.rel (!%p10_p4) target bundleno = 1 (0x1), region = 62 }

// kernel: block_forward.2
= control target key start
LH: loop header
LB: loop body
LE: loop exit
PB: predicated region body
PF: predicated region fallthrough
CT: control target
= control target key end

     0   :  { %s3655_s15 = smov 0   ;;  %s3657_s16 = smov 0   ;;  %s4768_s0 = inlined_call_operand.vmem [shape: bf16[2,18,18,4], index: 0, kind: input, shape index: {}, may-alias: {0,1}]   ;;  %s4769_s1 = inlined_call_operand.vmem [shape: bf16[2,18,18,4], index: 1, kind: input, shape index: {}, may-alias: {0,1}]   ;;  %s4770_s2 = inlined_call_operand.vmem [shape: bf16[36,128], index: 2, kind: input, shape index: {}]   ;;  %s4771_s3 = inlined_call_operand.vmem [shape: bf16[512,128], index: 3, kind: output, shape index: {0}]   ;;  %s4772_s4 = inlined_call_operand.vmem [shape: f32[16,128], index: 4, kind: output, shape index: {1}]  }
   0x1   :  { %s3659_s17 = smov 0  }
   0x2 LB: > { %s27_s18 = sadd.s32 1, %s3616_s16  ;;  %p3027_p0 = scmp.ge.s32.totalorder %s3620_s17, 1  ;;  %s3620_s17 = sphi %s3659_s17, %s15_s17   ;;  %s3616_s16 = sphi %s3657_s16, %s4774_s16   ;;  %s3612_s15 = sphi %s3655_s15, %s4773_s15  }
   0x3   : > { %p29_p1 = scmp.ge.s32.totalorder %s27_s18, 2  ;;  %p225_p2 = scmp.lt.s32.totalorder %s3620_s17, 3 }
   0x5   : > { %s4776_s18 = smov (%p29_p1, %s27_s18), 0  ;;  %p226_p3 = pnand %p3027_p0, %p225_p2 }
   0x6   : > { %p285_p4 = scmp.lt.s32.totalorder (!%p226_p3), %s3612_s15, 1  ;;  %vm378_vm0 = vcmask (!%p226_p3), 27648   ;;  %vm381_vm1 = vcmask (!%p226_p3), 24576   ;;  %vm1036_vm2 = vcmask (!%p226_p3), 1046528   ;;  %s3622_s24 = smov (!%p226_p3), 12   ;;  %vm2458_vm4 = vcmask (!%p226_p3), 1041408  }
   0x7   : > { %229 = sbr.rel (%p226_p3) target bundleno = 644 (0x284), region = 32  ;;  %vm763_vm3 = vsmask.f32 (!%p226_p3), 7424  ;;  %s3623_s25 = smov (!%p226_p3), 24   ;;  %vm2141_vm5 = vcmask (!%p226_p3), 31744   ;;  %vm2174_vm6 = vcmask (!%p226_p3), 64512  }
   0x8   : > { %s3624_s26 = smov (!%p226_p3), 20   ;;  %s3625_s27 = smov (!%p226_p3), 8   ;;  %vm2207_vm7 = vcmask (!%p226_p3), 97280   ;;  %vm2240_vm8 = vcmask (!%p226_p3), 130048   ;;  %vm2273_vm9 = vcmask (!%p226_p3), 162816   ;;  %vm2306_vm10 = vcmask (!%p226_p3), 195584  }
   0x9   : > { %s3626_s6 = smov (!%p226_p3), 4   ;;  %s3627_s7 = smov (!%p226_p3), 16   ;;  %vm2339_vm11 = vcmask (!%p226_p3), 228352   ;;  %vm2372_vm12 = vcmask (!%p226_p3), 261120   ;;  %vm2425_vm13 = vcmask (!%p226_p3), 293888  }
   0xa   : > { %s3628_s8 = smov (!%p226_p3), 28   ;;  %s3629_s9 = smov (!%p226_p3), 32  }
   0xb   : > { %s3030_s21 = sshll.u32 (!%p226_p3), %s3612_s15, 5 }
   0xc   : > { %p317_p5 = scmp.lt.s32.totalorder (!%p226_p3), %s3030_s21, 63 }
   0xe   : > { %s3677_s19 = scalar_select %p285_p4, %s3612_s15, 1 }
   0xf   : > { %s4778_s21 = smov (!%p317_p5, %s3030_s21), 63 }
  0x10   : > { %s3424_s20 = smul.u32 216, %s3677_s19  ;;  %s3031_s22 = sshll.u32 %s4778_s21, 2 }
  0x12   : > { %s3685_s23 = scalar_lea.vmem %s4768_s0, %s3424_s20  ;;  %s3231_s12 = sadd.s32 192, %s3424_s20 }
  0x13   : > { %v336_v0 = vld [vmem:[%s3685_s23 + $0x18] sm:$0xf]  ;;  %v337_v1 = vld [vmem:[%s3685_s23 + $0x1c] sm:$0xf]  ;;  %v333_v2 = vld [vmem:[%s3685_s23 + $0xc] sm:$0xf]  ;;  %s4244_s20 = scalar_lea.vmem %s4769_s1, %s3231_s12 }
  0x14   : > { %386 = vst.msk [vmem:[#allocation2 + $0x18] sm:$0xf] %vm378_vm0, %v336_v0  ;;  %387 = vst.msk [vmem:[#allocation2 + $0x1c] sm:$0xf] %vm378_vm0, %v337_v1  ;;  %v334_v3 = vld [vmem:[%s3685_s23 + $0x10] sm:$0xf] }
  0x15   : > { %383 = vst.msk [vmem:[#allocation2 + $0xc] sm:$0xf] %vm378_vm0, %v333_v2  ;;  %v339_v4 = vld [vmem:[%s3685_s23 + $0x24] sm:$0xf]  ;;  %v340_v5 = vld [vmem:[%s3685_s23 + $0x28] sm:$0xf] }
  0x16   : > { %384 = vst.msk [vmem:[#allocation2 + $0x10] sm:$0xf] %vm378_vm0, %v334_v3  ;;  %389 = vst.msk [vmem:[#allocation2 + $0x24] sm:$0xf] %vm378_vm0, %v339_v4  ;;  %v335_v6 = vld [vmem:[%s3685_s23 + $0x14] sm:$0x1] }
  0x17   : > { %390 = vst.msk [vmem:[#allocation2 + $0x28] sm:$0xf] %vm378_vm0, %v340_v5  ;;  %v330_v7 = vld [vmem:[%s3685_s23] sm:$0xf]  ;;  %v331_v8 = vld [vmem:[%s3685_s23 + $0x4] sm:$0xf] }
  0x18   : > { %385 = vst.msk [vmem:[#allocation2 + $0x14] sm:$0x1] %vm381_vm1, %v335_v6  ;;  %v332_v9 = vld [vmem:[%s3685_s23 + $0x8] sm:$0x1]  ;;  %v338_v10 = vld [vmem:[%s3685_s23 + $0x20] sm:$0x1] }
  0x19   : > { %379 = vst.msk [vmem:[#allocation2] sm:$0xf] %vm378_vm0, %v330_v7  ;;  %380 = vst.msk [vmem:[#allocation2 + $0x4] sm:$0xf] %vm378_vm0, %v331_v8  ;;  %v341_v11 = vld [vmem:[%s3685_s23 + $0x2c] sm:$0x1] }
  0x1a   : > { %382 = vst.msk [vmem:[#allocation2 + $0x8] sm:$0x1] %vm381_vm1, %v332_v9  ;;  %388 = vst.msk [vmem:[#allocation2 + $0x20] sm:$0x1] %vm381_vm1, %v338_v10  ;;  %v342_v12 = vld [vmem:[%s3685_s23 + $0x30] sm:$0xf] }
  0x1b   : > { %391 = vst.msk [vmem:[#allocation2 + $0x2c] sm:$0x1] %vm381_vm1, %v341_v11  ;;  %v343_v13 = vld [vmem:[%s3685_s23 + $0x34] sm:$0xf]  ;;  %v344_v14 = vld [vmem:[%s3685_s23 + $0x38] sm:$0x1] }
  0x1c   : > { %392 = vst.msk [vmem:[#allocation2 + $0x30] sm:$0xf] %vm378_vm0, %v342_v12  ;;  %393 = vst.msk [vmem:[#allocation2 + $0x34] sm:$0xf] %vm378_vm0, %v343_v13  ;;  %v345_v15 = vld [vmem:[%s3685_s23 + $0x3c] sm:$0xf] }
  0x1d   : > { %394 = vst.msk [vmem:[#allocation2 + $0x38] sm:$0x1] %vm381_vm1, %v344_v14  ;;  %v346_v16 = vld [vmem:[%s3685_s23 + $0x40] sm:$0xf]  ;;  %v347_v17 = vld [vmem:[%s3685_s23 + $0x44] sm:$0x1] }
  0x1e   : > { %395 = vst.msk [vmem:[#allocation2 + $0x3c] sm:$0xf] %vm378_vm0, %v345_v15  ;;  %396 = vst.msk [vmem:[#allocation2 + $0x40] sm:$0xf] %vm378_vm0, %v346_v16  ;;  %v348_v18 = vld [vmem:[%s3685_s23 + $0x48] sm:$0xf] }
  0x1f   : > { %397 = vst.msk [vmem:[#allocation2 + $0x44] sm:$0x1] %vm381_vm1, %v347_v17  ;;  %v349_v19 = vld [vmem:[%s3685_s23 + $0x4c] sm:$0xf]  ;;  %v350_v20 = vld [vmem:[%s3685_s23 + $0x50] sm:$0x1] }
  0x20   : > { %398 = vst.msk [vmem:[#allocation2 + $0x48] sm:$0xf] %vm378_vm0, %v348_v18  ;;  %399 = vst.msk [vmem:[#allocation2 + $0x4c] sm:$0xf] %vm378_vm0, %v349_v19  ;;  %v351_v21 = vld [vmem:[%s3685_s23 + $0x54] sm:$0xf] }
  0x21   : > { %400 = vst.msk [vmem:[#allocation2 + $0x50] sm:$0x1] %vm381_vm1, %v350_v20  ;;  %v352_v22 = vld [vmem:[%s3685_s23 + $0x58] sm:$0xf]  ;;  %v353_v23 = vld [vmem:[%s3685_s23 + $0x5c] sm:$0x1] }
  0x22   : > { %v508_v24 = vld [vmem:[#allocation2 + $0x18] sm:$0xf]  ;;  %v509_v25 = vld [vmem:[#allocation2 + $0x1c] sm:$0xf]  ;;  %401 = vst.msk [vmem:[#allocation2 + $0x54] sm:$0xf] %vm378_vm0, %v351_v21 }
  0x23   : > { %v555_v26 = vld [vmem:[#allocation2 + $0x18] sm:$0xe]  ;;  %402 = vst.msk [vmem:[#allocation2 + $0x58] sm:$0xf] %vm378_vm0, %v352_v22  ;;  %v3735_v27 = vcombine.low %v508_v24, %v509_v25  ;;  %v506_v29 = vld [vmem:[#allocation2 + $0xc] sm:$0xf] }
  0x24   : > { %403 = vst.msk [vmem:[#allocation2 + $0x5c] sm:$0x1] %vm381_vm1, %v353_v23  ;;  %v3114_v28 = vcombine.low %v555_v26, %v509_v25  ;;  %v507_v30 = vld [vmem:[#allocation2 + $0x10] sm:$0xf]  ;;  %v554_v31 = vld [vmem:[#allocation2 + $0xc] sm:$0xe] }
  0x25   : > { %v3737_v32 = vcombine.low %v506_v29, %v507_v30  ;;  %v3113_v33 = vcombine.low %v554_v31, %v507_v30  ;;  %v573_v34 = vld [vmem:[#allocation2 + $0x24] sm:$0xf]  ;;  %v3739_v35 = vld [vmem:[#allocation2 + $0x28] sm:$0xf]  ;;  %1199 = vrot.lane.b32.xlu1 %v3735_v27, %s3622_s24  ;;  %v1292_v36 = vshll.u32 %v3735_v27, 16  ;;  %v1290_v49 = vshrl.u32 %v3735_v27, 16 }
  0x26   : > { %v3745_v37 = vcombine.low %v573_v34, %v3739_v35  ;;  %v571_v38 = vld [vmem:[#allocation2 + $0x18] sm:$0xf]  ;;  %v3747_v39 = vld [vmem:[#allocation2 + $0x1c] sm:$0xf]  ;;  %v3755_v43 = vrot.slane %v3114_v28, 1  ;;  %v3537_v27 = vld [vmem:[%s4770_s2] sm:$0xff]  }
  0x27   : > { %1197 = vrot.lane.b32.xlu0 %v3737_v32, %s3622_s24  ;;  %v1280_v40 = vshll.u32 %v3737_v32, 16  ;;  %v3753_v41 = vcombine.low %v571_v38, %v3747_v39  ;;  %v1549_v42 = vrot.slane %v3113_v33, 1  ;;  %v3758_v45 = vld [vmem:[#allocation2 + $0x14] ss:$0 sps:$4 sm:$0x11]   ;;  %v1294_v7 = vrot.slane %v1292_v36, 1  ;;  %3378 = vmatprep.subr.bf16.mxu0 %v3537_v27 }
  0x28   : > { %v1804_v44 = vshll.u32 %v3745_v37, 16  ;;  %v442_v46 = vld [vmem:[#allocation2 + $0x4] sm:$0xf]  ;;  %v489_v48 = vld [vmem:[#allocation2] sm:$0xe]  ;;  %v1550_v50 = vrot.slane %v3758_v45, 1  ;;  %3379 = vmatpush3.bf16.msra.mxu0 %v3537_v27  ;;  %3416 = vmatprep.subr.bf16.mxu1 %v3537_v27 }
  0x29   : > { %v1792_v47 = vshll.u32 %v3753_v41, 16  ;;  %1711 = vrot.lane.b32.xlu1 %v3745_v37, %s3623_s25  ;;  %v3468_v51 = vld [vmem:[#allocation2 + $0x8] ss:$0 sps:$4 sm:$0x11]   ;;  %v3065_v52 = vcombine.low %v489_v48, %v442_v46  ;;  %v441_v53 = vld [vmem:[#allocation2] sm:$0xf]  ;;  %v1295_v24 = vor.u32 %v1294_v7, %v1290_v49  ;;  %3419 = vmatpush3.bf16.msra.mxu1 %v3537_v27 }
  0x2a   : > { %v3767_v54 = vcombine.low %v441_v53, %v442_v46  ;;  %v443_v55 = vld [vmem:[#allocation2 + $0xc] sm:$0xf]  ;;  %v444_v56 = vld [vmem:[#allocation2 + $0x10] sm:$0xf]  ;;  %v1551_v57 = vsel %vm1036_vm2, %v1549_v42, %v1550_v50  ;;  %v1038_v59 = vrot.slane %v3468_v51, 1  ;;  %v772_v2 = vshll.u32 %v3468_v51, 16 }
  0x2b   : > { %1709 = vrot.lane.b32.xlu0 %v3753_v41, %s3623_s25  ;;  %v1037_v58 = vrot.slane %v3065_v52, 1  ;;  %v490_v60 = vld [vmem:[#allocation2 + $0xc] sm:$0xe]  ;;  %v3770_v61 = vcombine.low %v443_v55, %v444_v56  ;;  %v3472_v62 = vld [vmem:[#allocation2 + $0x14] ss:$0 sps:$4 sm:$0x11]  }
  0x2c   : > { %v3066_v63 = vcombine.low %v490_v60, %v444_v56  ;;  %v765_v0 = vshrl.u32 %v3767_v54, 16  ;;  %v767_v1 = vshll.u32 %v3767_v54, 16  ;;  %v3474_v4 = vld [vmem:[#allocation2 + $0x20] ss:$0 sps:$4 sm:$0x11]   ;;  %v1041_v9 = vrot.slane %v3472_v62, 1 }
  0x2d   : > { %v1039_v3 = vsel %vm1036_vm2, %v1037_v58, %v1038_v59  ;;  %v777_v5 = vshrl.u32 %v3770_v61, 16  ;;  %v779_v6 = vshll.u32 %v3770_v61, 16  ;;  %v774_v11 = vrot.slane %v772_v2, 1  ;;  %v3779_v15 = vld [vmem:[#allocation2 + $0x2c] ss:$0 sps:$4 sm:$0x11]  }
  0x2e   : > { %1085 = vrot.lane.b32.xlu1 %v1039_v3, %s3625_s27  ;;  %v1040_v8 = vrot.slane %v3066_v63, 1  ;;  %v769_v10 = vrot.slane %v767_v1, 1  ;;  %v1553_v12 = vrot.slane %v3474_v4, 1  ;;  %v784_v14 = vshll.u32 %v3472_v62, 16  ;;  %v445_v20 = vld [vmem:[#allocation2 + $0x18] sm:$0xf] }
  0x2f   : > { %1597 = vrot.lane.b32.xlu0 %v1551_v57, %s3624_s26  ;;  %v781_v13 = vrot.slane %v779_v6, 1  ;;  %v1297_v18 = vshll.u32 %v3474_v4, 16  ;;  %v1278_v19 = vshrl.u32 %v3737_v32, 16  ;;  %v619_v21 = vld [vmem:[#allocation2 + $0x18] sm:$0xe]  ;;  %v1282_v25 = vrot.slane %v1280_v40, 1 }
  0x30   : > { %v1042_v16 = vsel %vm1036_vm2, %v1040_v8, %v1041_v9  ;;  %v770_v17 = vor.u32 %v769_v10, %v765_v0  ;;  %v786_v23 = vrot.slane %v784_v14, 1  ;;  %v3783_v26 = vld [vmem:[#allocation2 + $0x20] ss:$0 sps:$4 sm:$0x11]   ;;  %v1285_v30 = vshll.u32 %v3758_v45, 16  ;;  %v3542_v33 = vld [vmem:[%s4770_s2 + $0x8] sm:$0xff]  }
  0x31   : > { %v782_v22 = vor.u32 %v781_v13, %v777_v5  ;;  %v1299_v29 = vrot.slane %v1297_v18, 1  ;;  %v1802_v31 = vshrl.u32 %v3745_v37, 16  ;;  %v3792_v32 = vld [vmem:[#allocation2 + $0x1c] sm:$0xf]  ;;  %v1554_v34 = vsel %vm1036_vm2, %v3755_v43, %v1553_v12  ;;  %v447_v42 = vld [vmem:[#allocation2 + $0x24] sm:$0xf]  ;;  %3380 = vmatprep.subr.bf16.mxu0 %v3542_v33  ;;  %3417 = vmatprep.subr.bf16.mxu1 %v3542_v33 }
  0x32   : > { %1087 = vrot.lane.b32.xlu1 %v1042_v16, %s3625_s27  ;;  %v775_v28 = vsel %vm763_vm3, %v770_v17, %v774_v11  ;;  %v1806_v38 = vrot.slane %v1804_v44, 1  ;;  %v1809_v40 = vshll.u32 %v3779_v15, 16  ;;  %v1283_v45 = vor.u32 %v1282_v25, %v1278_v19  ;;  %v3807_v50 = vld [vmem:[#allocation2 + $0x20] ss:$0 sps:$4 sm:$0x11]   ;;  %3381 = vmatpush3.bf16.msra.mxu0 %v3542_v33 }
  0x33   : > { %956 = vrot.lane.b32.xlu0 %v775_v28, %s3626_s6  ;;  %v787_v36 = vsel %vm763_vm3, %v782_v22, %v786_v23  ;;  %v1287_v46 = vrot.slane %v1285_v30, 1  ;;  %v1790_v48 = vshrl.u32 %v3753_v41, 16  ;;  %v1794_v49 = vrot.slane %v1792_v47, 1  ;;  %v3813_v44 = vld [vmem:[#allocation2 + $0x28] sm:$0xf]  ;;  %3420 = vmatpush3.bf16.msra.mxu1 %v3542_v33 }
  0x34   : > { %v1797_v43 = vshll.u32 %v3783_v26, 16  ;;  %v3811_v37 = vcombine.low %v445_v20, %v3792_v32  ;;  %v3161_v51 = vcombine.low %v619_v21, %v3747_v39  ;;  %v1300_v41 = vsel %vm763_vm3, %v1295_v24, %v1299_v29  ;;  %v3818_v52 = vld [vmem:[#allocation2 + $0x2c] ss:$0 sps:$4 sm:$0x11]   ;;  %v620_v62 = vld [vmem:[#allocation2 + $0x24] sm:$0xe] }
  0x35   : > { %v1807_v47 = vor.u32 %v1806_v38, %v1802_v31  ;;  %v1811_v53 = vrot.slane %v1809_v40, 1  ;;  %v796_v57 = vshll.u32 %v3807_v50, 16  ;;  %v1288_v58 = vsel %vm763_vm3, %v1283_v45, %v1287_v46  ;;  %v492_v7 = vld [vmem:[#allocation2 + $0x24] sm:$0xe]  ;;  %v491_v8 = vld [vmem:[#allocation2 + $0x18] sm:$0xe] }
  0x36   : > { %1599 = vrot.lane.b32.xlu1 %v1554_v34, %s3624_s26  ;;  %v789_v55 = vshrl.u32 %v3811_v37, 16  ;;  %v791_v56 = vshll.u32 %v3811_v37, 16  ;;  %v1795_v39 = vor.u32 %v1794_v49, %v1790_v48  ;;  %v1799_v59 = vrot.slane %v1797_v43, 1  ;;  %v512_v13 = vld [vmem:[#allocation2 + $0x30] sm:$0xf] }
  0x37   : > { %958 = vrot.lane.b32.xlu0 %v787_v36, %s3626_s6  ;;  %v3826_v60 = vcombine.low %v447_v42, %v3813_v44  ;;  %v2061_v0 = vrot.slane %v3161_v51, 1  ;;  %v808_v2 = vshll.u32 %v3818_v52, 16  ;;  %v1812_v3 = vsel %vm763_vm3, %v1807_v47, %v1811_v53  ;;  %v513_v14 = vld [vmem:[#allocation2 + $0x34] sm:$0xf]  ;;  %v510_v16 = vld [vmem:[#allocation2 + $0x24] sm:$0xf] }
  0x38   : > { %v793_v63 = vrot.slane %v791_v56, 1  ;;  %v798_v5 = vrot.slane %v796_v57, 1  ;;  %v3162_v9 = vcombine.low %v620_v62, %v3739_v35  ;;  %v1800_v10 = vsel %vm763_vm3, %v1795_v39, %v1799_v59  ;;  %v511_v17 = vld [vmem:[#allocation2 + $0x28] sm:$0xf]  ;;  %v557_v38 = vld [vmem:[#allocation2 + $0x30] sm:$0xe] }
  0x39   : > { %v803_v1 = vshll.u32 %v3826_v60, 16  ;;  %v801_v6 = vshrl.u32 %v3826_v60, 16  ;;  %v2062_v11 = vrot.slane %v3783_v26, 1  ;;  %v810_v18 = vrot.slane %v808_v2, 1  ;;  %v556_v40 = vld [vmem:[#allocation2 + $0x24] sm:$0xe] }
  0x3a   : > { %1471 = vrot.lane.b32.xlu1 %v1300_v41, %s3627_s7  ;;  %v794_v4 = vor.u32 %v793_v63, %v789_v55  ;;  %v3068_v19 = vcombine.low %v492_v7, %v3813_v44  ;;  %v3067_v21 = vcombine.low %v491_v8, %v3792_v32  ;;  %v3084_v22 = vcombine.low %v512_v13, %v513_v14  ;;  %v3487_v29 = vld [vmem:[#allocation2 + $0x38] ss:$0 sps:$4 sm:$0x11]   ;;  %v577_v46 = vld [vmem:[#allocation2 + $0x3c] sm:$0xf] }
  0x3b   : > { %1469 = vrot.lane.b32.xlu0 %v1288_v58, %s3627_s7  ;;  %v805_v12 = vrot.slane %v803_v1, 1  ;;  %v2063_v23 = vsel %vm1036_vm2, %v2061_v0, %v2062_v11  ;;  %v2064_v24 = vrot.slane %v3162_v9, 1  ;;  %v2065_v25 = vrot.slane %v3779_v15, 1  ;;  %v3488_v15 = vld [vmem:[#allocation2 + $0x2c] ss:$0 sps:$4 sm:$0x11]  }
  0x3c   : > { %v799_v20 = vsel %vm763_vm3, %v794_v4, %v798_v5  ;;  %v3083_v26 = vcombine.low %v510_v16, %v511_v17  ;;  %v1047_v27 = vrot.slane %v3818_v52, 1  ;;  %v1044_v28 = vrot.slane %v3807_v50, 1  ;;  %v3853_v43 = vld [vmem:[#allocation2 + $0x40] sm:$0xf]  ;;  %v575_v47 = vld [vmem:[#allocation2 + $0x30] sm:$0xf] }
  0x3d   : > { %v806_v35 = vor.u32 %v805_v12, %v801_v6  ;;  %v1046_v31 = vrot.slane %v3068_v19, 1  ;;  %v1043_v32 = vrot.slane %v3067_v21, 1  ;;  %v1316_v33 = vshll.u32 %v3084_v22, 16  ;;  %v3856_v52 = vld [vmem:[#allocation2 + $0x34] sm:$0xf] }
  0x3e   : > { %1983 = vrot.lane.b32.xlu1 %v1812_v3, %s3628_s8  ;;  %v2066_v34 = vsel %vm1036_vm2, %v2064_v24, %v2065_v25  ;;  %v1304_v36 = vshll.u32 %v3083_v26, 16  ;;  %v1314_v42 = vshrl.u32 %v3084_v22, 16  ;;  %v1321_v45 = vshll.u32 %v3487_v29, 16  ;;  %v449_v63 = vld [vmem:[#allocation2 + $0x30] sm:$0xf] }
  0x3f   : > { %1981 = vrot.lane.b32.xlu0 %v1800_v10, %s3628_s8  ;;  %v811_v30 = vsel %vm763_vm3, %v806_v35, %v810_v18  ;;  %v1048_v48 = vsel %vm1036_vm2, %v1046_v31, %v1047_v27  ;;  %v1318_v49 = vrot.slane %v1316_v33, 1  ;;  %v1302_v50 = vshrl.u32 %v3083_v26, 16  ;;  %v3862_v0 = vld [vmem:[#allocation2 + $0x34] sm:$0xf]  ;;  %v451_v12 = vld [vmem:[#allocation2 + $0x3c] sm:$0xf] }
  0x40   : > { %v1045_v44 = vsel %vm1036_vm2, %v1043_v32, %v1044_v28  ;;  %v1306_v51 = vrot.slane %v1304_v36, 1  ;;  %v1309_v41 = vshll.u32 %v3488_v15, 16  ;;  %v3116_v53 = vcombine.low %v557_v38, %v513_v14  ;;  %v3865_v5 = vld [vmem:[#allocation2 + $0x44] ss:$0 sps:$4 sm:$0x11]  }
  0x41   : > { %v3115_v55 = vcombine.low %v556_v40, %v511_v17  ;;  %v1319_v56 = vor.u32 %v1318_v49, %v1314_v42  ;;  %v1323_v57 = vrot.slane %v1321_v45, 1  ;;  %v3132_v58 = vcombine.low %v577_v46, %v3853_v43  ;;  %v3494_v9 = vld [vmem:[#allocation2 + $0x38] ss:$0 sps:$4 sm:$0x11]   ;;  %v452_v13 = vld [vmem:[#allocation2 + $0x40] sm:$0xf] }
  0x42   : > { %960 = vrot.lane.b32.xlu1 %v799_v20, %s3626_s6  ;;  %v3131_v39 = vcombine.low %v575_v47, %v3856_v52  ;;  %v1307_v59 = vor.u32 %v1306_v51, %v1302_v50  ;;  %v1311_v62 = vrot.slane %v1309_v41, 1  ;;  %v1558_v1 = vrot.slane %v3116_v53, 1  ;;  %v3876_v17 = vld [vmem:[#allocation2 + $0x38] ss:$0 sps:$4 sm:$0x11]  }
  0x43   : > { %2109 = vrot.lane.b32.xlu0 %v2063_v23, %s3629_s9  ;;  %v1559_v2 = vrot.slane %v3487_v29, 1  ;;  %v1555_v3 = vrot.slane %v3115_v55, 1  ;;  %v1556_v4 = vrot.slane %v3488_v15, 1  ;;  %v1324_v6 = vsel %vm763_vm3, %v1319_v56, %v1323_v57  ;;  %v622_v25 = vld [vmem:[#allocation2 + $0x3c] sm:$0xe] }
  0x44   : > { %v1828_v7 = vshll.u32 %v3132_v58, 16  ;;  %v1816_v8 = vshll.u32 %v3131_v39, 16  ;;  %v3870_v10 = vcombine.low %v449_v63, %v3862_v0  ;;  %v1312_v11 = vsel %vm763_vm3, %v1307_v59, %v1311_v62  ;;  %v494_v45 = vld [vmem:[#allocation2 + $0x3c] sm:$0xe]  ;;  %v516_v46 = vld [vmem:[#allocation2 + $0x48] sm:$0xf] }
  0x45   : > { %v1560_v14 = vsel %vm1036_vm2, %v1558_v1, %v1559_v2  ;;  %v1833_v16 = vshll.u32 %v3865_v5, 16  ;;  %v1826_v18 = vshrl.u32 %v3132_v58, 16  ;;  %v3880_v35 = vcombine.low %v451_v12, %v452_v13  ;;  %v3897_v51 = vld [vmem:[#allocation2 + $0x4c] sm:$0xf]  ;;  %v514_v53 = vld [vmem:[#allocation2 + $0x3c] sm:$0xf] }
  0x46   : > { %962 = vrot.lane.b32.xlu1 %v811_v30, %s3626_s6  ;;  %v1830_v19 = vrot.slane %v1828_v7, 1  ;;  %v815_v20 = vshll.u32 %v3870_v10, 16  ;;  %v1557_v21 = vsel %vm1036_vm2, %v1555_v3, %v1556_v4  ;;  %v1818_v23 = vrot.slane %v1816_v8, 1  ;;  %v3886_v30 = vld [vmem:[#allocation2 + $0x44] ss:$0 sps:$4 sm:$0x11]  }
  0x47   : > { %2111 = vrot.lane.b32.xlu0 %v2066_v34, %s3629_s9  ;;  %v1821_v24 = vshll.u32 %v3494_v9, 16  ;;  %v1835_v27 = vrot.slane %v1833_v16, 1  ;;  %v813_v28 = vshrl.u32 %v3870_v10, 16  ;;  %v820_v29 = vshll.u32 %v3876_v17, 16  ;;  %v3900_v55 = vld [vmem:[#allocation2 + $0x40] sm:$0xf] }
  0x48   : > { %v1831_v31 = vor.u32 %v1830_v19, %v1826_v18  ;;  %v817_v32 = vrot.slane %v815_v20, 1  ;;  %v827_v33 = vshll.u32 %v3880_v35, 16  ;;  %v3164_v38 = vcombine.low %v622_v25, %v3853_v43  ;;  %v354_v4 = vld [vmem:[%s3685_s23 + $0x60] sm:$0xf]  ;;  %v356_v12 = vld [vmem:[%s3685_s23 + $0x68] sm:$0x1] }
  0x49   : > { %v1823_v15 = vrot.slane %v1821_v24, 1  ;;  %v822_v40 = vrot.slane %v820_v29, 1  ;;  %v825_v42 = vshrl.u32 %v3880_v35, 16  ;;  %v2068_v47 = vrot.slane %v3494_v9, 1  ;;  %404 = vst.msk [vmem:[#allocation2 + $0x60] sm:$0xf] %vm378_vm0, %v354_v4 }
  0x4a   : > { %1091 = vrot.lane.b32.xlu1 %v1048_v48, %s3625_s27  ;;  %v1836_v48 = vsel %vm763_vm3, %v1831_v31, %v1835_v27  ;;  %v818_v49 = vor.u32 %v817_v32, %v813_v28  ;;  %v829_v50 = vrot.slane %v827_v33, 1  ;;  %v3070_v56 = vcombine.low %v494_v45, %v452_v13  ;;  %v3917_v9 = vld [vmem:[#allocation2 + $0x50] ss:$0 sps:$4 sm:$0x11]   ;;  %406 = vst.msk [vmem:[#allocation2 + $0x68] sm:$0x1] %vm381_vm1, %v356_v12 }
  0x4b   : > { %1089 = vrot.lane.b32.xlu0 %v1045_v44, %s3625_s27  ;;  %v832_v44 = vshll.u32 %v3886_v30, 16  ;;  %v3904_v57 = vcombine.low %v516_v46, %v3897_v51  ;;  %v2070_v62 = vrot.slane %v3164_v38, 1  ;;  %v2071_v1 = vrot.slane %v3865_v5, 1  ;;  %v559_v19 = vld [vmem:[#allocation2 + $0x48] sm:$0xe] }
  0x4c   : > { %v3085_v3 = vcombine.low %v514_v53, %v3900_v55  ;;  %v1052_v7 = vrot.slane %v3070_v56, 1  ;;  %v1053_v5 = vrot.slane %v3886_v30, 1  ;;  %v1050_v16 = vrot.slane %v3876_v17, 1  ;;  %v357_v20 = vld [vmem:[%s3685_s23 + $0x6c] sm:$0xf] }
  0x4d   : > { %v834_v59 = vrot.slane %v832_v44, 1  ;;  %v1340_v8 = vshll.u32 %v3904_v57, 16  ;;  %v2072_v13 = vsel %vm1036_vm2, %v2070_v62, %v2071_v1  ;;  %v581_v24 = vld [vmem:[#allocation2 + $0x54] sm:$0xf]  ;;  %407 = vst.msk [vmem:[#allocation2 + $0x6c] sm:$0xf] %vm378_vm0, %v357_v20 }
  0x4e   : > { %1203 = vrot.lane.b32.xlu1 %v3084_v22, %s3622_s24  ;;  %v1814_v22 = vshrl.u32 %v3131_v39, 16  ;;  %v1328_v18 = vshll.u32 %v3085_v3, 16  ;;  %v359_v25 = vld [vmem:[%s3685_s23 + $0x74] sm:$0x1]  ;;  %v1054_v17 = vsel %vm1036_vm2, %v1052_v7, %v1053_v5  ;;  %v3940_v28 = vld [vmem:[#allocation2 + $0x58] sm:$0xf] }
  0x4f   : > { %1201 = vrot.lane.b32.xlu0 %v3083_v26, %s3622_s24  ;;  %v621_v26 = vld [vmem:[#allocation2 + $0x30] sm:$0xe]  ;;  %409 = vst.msk [vmem:[#allocation2 + $0x74] sm:$0x1] %vm381_vm1, %v359_v25  ;;  %v360_v29 = vld [vmem:[%s3685_s23 + $0x78] sm:$0xf]  ;;  %v3134_v38 = vcombine.low %v581_v24, %v3940_v28 }
  0x50   : > { %v3163_v34 = vcombine.low %v621_v26, %v3856_v52  ;;  %v1819_v36 = vor.u32 %v1818_v23, %v1814_v22  ;;  %v493_v52 = vld [vmem:[#allocation2 + $0x30] sm:$0xe]  ;;  %v1338_v22 = vshrl.u32 %v3904_v57, 16  ;;  %v1342_v23 = vrot.slane %v1340_v8, 1  ;;  %v558_v31 = vld [vmem:[#allocation2 + $0x3c] sm:$0xe] }
  0x51   : > { %v3069_v2 = vcombine.low %v493_v52, %v3862_v0  ;;  %v1345_v26 = vshll.u32 %v3917_v9, 16  ;;  %v1326_v32 = vshrl.u32 %v3085_v3, 16  ;;  %v1330_v33 = vrot.slane %v1328_v18, 1  ;;  %410 = vst.msk [vmem:[#allocation2 + $0x78] sm:$0xf] %vm378_vm0, %v360_v29 }
  0x52   : > { %1475 = vrot.lane.b32.xlu1 %v1324_v6, %s3627_s7  ;;  %v1824_v41 = vsel %vm763_vm3, %v1819_v36, %v1823_v15  ;;  %v2067_v43 = vrot.slane %v3163_v34, 1  ;;  %v355_v6 = vld [vmem:[%s3685_s23 + $0x64] sm:$0xf]  ;;  %v3118_v34 = vcombine.low %v559_v19, %v3897_v51  ;;  %v579_v36 = vld [vmem:[#allocation2 + $0x48] sm:$0xf]  ;;  %v1852_v51 = vshll.u32 %v3134_v38, 16 }
  0x53   : > { %1473 = vrot.lane.b32.xlu0 %v1312_v11, %s3627_s7  ;;  %405 = vst.msk [vmem:[#allocation2 + $0x64] sm:$0xf] %vm378_vm0, %v355_v6  ;;  %v3923_v11 = vld [vmem:[#allocation2 + $0x44] ss:$0 sps:$4 sm:$0x11]   ;;  %v1347_v45 = vrot.slane %v1345_v26, 1 }
  0x54   : > { %v2069_v63 = vsel %vm1036_vm2, %v2067_v43, %v2068_v47  ;;  %v1333_v27 = vshll.u32 %v3923_v11, 16  ;;  %v580_v15 = vld [vmem:[#allocation2 + $0x4c] sm:$0xf]  ;;  %v3955_v43 = vld [vmem:[#allocation2 + $0x5c] ss:$0 sps:$4 sm:$0x11]  }
  0x55   : > { %v3951_v44 = vld [vmem:[#allocation2 + $0x4c] sm:$0xf]  ;;  %v1565_v52 = vrot.slane %v3917_v9, 1  ;;  %v3967_v62 = vld [vmem:[#allocation2 + $0x58] sm:$0xf]  ;;  %v1857_v4 = vshll.u32 %v3955_v43, 16 }
  0x56   : > { %1603 = vrot.lane.b32.xlu1 %v1560_v14, %s3624_s26  ;;  %v1049_v14 = vrot.slane %v3069_v2, 1  ;;  %v1335_v46 = vrot.slane %v1333_v27, 1  ;;  %v623_v1 = vld [vmem:[#allocation2 + $0x48] sm:$0xe]  ;;  %v1850_v2 = vshrl.u32 %v3134_v38, 16 }
  0x57   : > { %1601 = vrot.lane.b32.xlu0 %v1557_v21, %s3624_s26  ;;  %v358_v21 = vld [vmem:[%s3685_s23 + $0x70] sm:$0xf]  ;;  %v3165_v12 = vcombine.low %v623_v1, %v580_v15  ;;  %v361_v18 = vld [vmem:[%s3685_s23 + $0x7c] sm:$0xf]  ;;  %v496_v29 = vld [vmem:[#allocation2 + $0x54] sm:$0xe] }
  0x58   : > { %408 = vst.msk [vmem:[#allocation2 + $0x70] sm:$0xf] %vm378_vm0, %v358_v21  ;;  %v1051_v30 = vsel %vm1036_vm2, %v1049_v14, %v1050_v16  ;;  %v1859_v16 = vrot.slane %v1857_v4, 1  ;;  %v3986_v21 = vld [vmem:[#allocation2 + $0x5c] ss:$0 sps:$4 sm:$0x11]  }
  0x59   : > { %411 = vst.msk [vmem:[#allocation2 + $0x7c] sm:$0xf] %vm378_vm0, %v361_v18  ;;  %v2073_v26 = vrot.slane %v3165_v12, 1  ;;  %v560_v12 = vld [vmem:[#allocation2 + $0x54] sm:$0xe] }
  0x5a   : > { %1715 = vrot.lane.b32.xlu1 %v3132_v58, %s3623_s25  ;;  %v823_v58 = vsel %vm763_vm3, %v818_v49, %v822_v40  ;;  %v3117_v40 = vcombine.low %v558_v31, %v3900_v55  ;;  %v3133_v49 = vcombine.low %v579_v36, %v580_v15  ;;  %v3960_v55 = vld [vmem:[#allocation2 + $0x50] ss:$0 sps:$4 sm:$0x11]   ;;  %v495_v31 = vld [vmem:[#allocation2 + $0x48] sm:$0xe]  ;;  %v856_v15 = vshll.u32 %v3986_v21, 16 }
  0x5b   : > { %1713 = vrot.lane.b32.xlu0 %v3131_v39, %s3623_s25  ;;  %v830_v39 = vor.u32 %v829_v50, %v825_v42  ;;  %v1343_v42 = vor.u32 %v1342_v23, %v1338_v22  ;;  %v453_v50 = vld [vmem:[#allocation2 + $0x48] sm:$0xf]  ;;  %v624_v23 = vld [vmem:[#allocation2 + $0x54] sm:$0xe]  ;;  %v2074_v27 = vrot.slane %v3960_v55, 1 }
  0x5c   : > { %v1561_v53 = vrot.slane %v3117_v40, 1  ;;  %v3963_v56 = vcombine.low %v453_v50, %v3951_v44  ;;  %v520_v40 = vld [vmem:[#allocation2 + $0x60] sm:$0xf]  ;;  %v363_v50 = vld [vmem:[%s3685_s23 + $0x84] sm:$0xf] }
  0x5d   : > { %v835_v0 = vsel %vm763_vm3, %v830_v39, %v834_v59  ;;  %v1348_v47 = vsel %vm763_vm3, %v1343_v42, %v1347_v45  ;;  %v1562_v39 = vrot.slane %v3923_v11, 1  ;;  %v455_v59 = vld [vmem:[#allocation2 + $0x54] sm:$0xf]  ;;  %v1845_v11 = vshll.u32 %v3960_v55, 16  ;;  %v4000_v45 = vld [vmem:[#allocation2 + $0x64] sm:$0xf] }
  0x5e   : > { %1987 = vrot.lane.b32.xlu1 %v1836_v48, %s3628_s8  ;;  %v1331_v48 = vor.u32 %v1330_v33, %v1326_v32  ;;  %v839_v7 = vshll.u32 %v3963_v56, 16  ;;  %v3977_v8 = vcombine.low %v455_v59, %v3967_v62  ;;  %v837_v19 = vshrl.u32 %v3963_v56, 16  ;;  %v362_v32 = vld [vmem:[%s3685_s23 + $0x80] sm:$0x1]  ;;  %413 = vst.msk [vmem:[#allocation2 + $0x84] sm:$0xf] %vm378_vm0, %v363_v50 }
  0x5f   : > { %1985 = vrot.lane.b32.xlu0 %v1824_v41, %s3628_s8  ;;  %v1564_v41 = vrot.slane %v3118_v34, 1  ;;  %v1563_v9 = vsel %vm1036_vm2, %v1561_v53, %v1562_v39  ;;  %v1847_v25 = vrot.slane %v1845_v11, 1  ;;  %412 = vst.msk [vmem:[#allocation2 + $0x80] sm:$0x1] %vm381_vm1, %v362_v32  ;;  %v3166_v42 = vcombine.low %v624_v23, %v3940_v28  ;;  %v561_v11 = vld [vmem:[#allocation2 + $0x60] sm:$0xe] }
  0x60   : > { %v841_v20 = vrot.slane %v839_v7, 1  ;;  %v851_v22 = vshll.u32 %v3977_v8, 16  ;;  %v849_v34 = vshrl.u32 %v3977_v8, 16  ;;  %v858_v55 = vrot.slane %v856_v15, 1  ;;  %v457_v32 = vld [vmem:[#allocation2 + $0x60] sm:$0xf] }
  0x61   : > { %v1566_v6 = vsel %vm1036_vm2, %v1564_v41, %v1565_v52  ;;  %v3072_v41 = vcombine.low %v496_v29, %v3967_v62  ;;  %v2076_v39 = vrot.slane %v3166_v42, 1  ;;  %v365_v62 = vld [vmem:[%s3685_s23 + $0x8c] sm:$0x1]  ;;  %v4030_v7 = vld [vmem:[#allocation2 + $0x68] ss:$0 sps:$4 sm:$0x11]  }
  0x62   : > { %964 = vrot.lane.b32.xlu1 %v823_v58, %s3626_s6  ;;  %v1336_v58 = vsel %vm763_vm3, %v1331_v48, %v1335_v46  ;;  %v842_v33 = vor.u32 %v841_v20, %v837_v19  ;;  %v853_v36 = vrot.slane %v851_v22, 1  ;;  %v3545_v46 = vld [vmem:[%s4770_s2 + $0x10] ss:$0 sps:$4 sm:$0x33]   ;;  %v518_v48 = vld [vmem:[#allocation2 + $0x54] sm:$0xf] }
  0x63   : > { %2113 = vrot.lane.b32.xlu0 %v2069_v63, %s3629_s9  ;;  %v3969_v63 = vld [vmem:[#allocation2 + $0x50] ss:$0 sps:$4 sm:$0x11]   ;;  %3422 = vmatprep.subr.msk.bf16.mxu0 %vm2458_vm4, %v3545_v46  ;;  %v2460_v28 = vsel %vm2458_vm4, %v3545_v46, 0  ;;  %415 = vst.msk [vmem:[#allocation2 + $0x8c] sm:$0x1] %vm381_vm1, %v365_v62 }
  0x64   : > { %v854_v53 = vor.u32 %v853_v36, %v849_v34  ;;  %3383 = vmatpush3.bf16.msra.mxu0 %v2460_v28  ;;  %3423 = vmatprep.subr.msk.bf16.mxu1 %vm2458_vm4, %v3545_v46  ;;  %v1058_v1 = vrot.slane %v3072_v41, 1  ;;  %v1056_v4 = vrot.slane %v3969_v63, 1  ;;  %v1369_v19 = vshll.u32 %v4030_v7, 16  ;;  %v585_v20 = vld [vmem:[#allocation2 + $0x6c] sm:$0xf] }
  0x65   : > { %3421 = vmatpush3.bf16.msra.mxu1 %v2460_v28  ;;  %v4057_v15 = vld [vmem:[#allocation2 + $0x74] ss:$0 sps:$4 sm:$0x11]   ;;  %v4065_v50 = vld [vmem:[#allocation2 + $0x68] ss:$0 sps:$4 sm:$0x11]  }
  0x66   : > { %966 = vrot.lane.b32.xlu1 %v835_v0, %s3626_s6  ;;  %v1838_v0 = vshrl.u32 %v3133_v49, 16  ;;  %v1571_v28 = vrot.slane %v4030_v7, 1  ;;  %v370_v62 = vld [vmem:[%s3685_s23 + $0xa0] sm:$0xf] }
  0x67   : > { %2115 = vrot.lane.b32.xlu0 %v2072_v13, %s3629_s9  ;;  %v844_v13 = vshll.u32 %v3969_v63, 16  ;;  %420 = vst.msk [vmem:[#allocation2 + $0xa0] sm:$0xf] %vm378_vm0, %v370_v62 }
  0x6a   : > { %1095 = vrot.lane.b32.xlu1 %v1054_v17, %s3625_s27  ;;  %v846_v17 = vrot.slane %v844_v13, 1 }
  0x6b   : > { %1093 = vrot.lane.b32.xlu0 %v1051_v30, %s3625_s27 }
  0x6c   : > { %v847_v52 = vsel %vm763_vm3, %v842_v33, %v846_v17  ;;  %v4055_v33 = vld [vmem:[#allocation2 + $0x64] sm:$0xf] }
  0x6d   : > { %v4068_v41 = vcombine.low %v457_v32, %v4055_v33 }
  0x6e   : > { %1207 = vrot.lane.b32.xlu1 %v3904_v57, %s3622_s24  ;;  %v1840_v57 = vshll.u32 %v3133_v49, 16 }
  0x6f   : > { %1205 = vrot.lane.b32.xlu0 %v3085_v3, %s3622_s24  ;;  %v1854_v3 = vrot.slane %v1852_v51, 1  ;;  %v3071_v51 = vcombine.low %v495_v31, %v3951_v44  ;;  %v2075_v44 = vsel %vm1036_vm2, %v2073_v26, %v2074_v27  ;;  %v3120_v26 = vcombine.low %v561_v11, %v4000_v45 }
  0x70   : > { %v1842_v5 = vrot.slane %v1840_v57, 1  ;;  %v2077_v57 = vrot.slane %v3955_v43, 1  ;;  %v859_v43 = vsel %vm763_vm3, %v854_v53, %v858_v55  ;;  %v1371_v31 = vrot.slane %v1369_v19, 1  ;;  %v368_v53 = vld [vmem:[%s3685_s23 + $0x98] sm:$0x1] }
  0x71   : > { %v1855_v14 = vor.u32 %v1854_v3, %v1850_v2  ;;  %v1059_v2 = vrot.slane %v3986_v21, 1  ;;  %v1055_v3 = vrot.slane %v3071_v51, 1  ;;  %v4041_v21 = vld [vmem:[#allocation2 + $0x70] sm:$0xf]  ;;  %v1570_v46 = vrot.slane %v3120_v26, 1 }
  0x72   : > { %1479 = vrot.lane.b32.xlu1 %v1348_v47, %s3627_s7  ;;  %v1843_v24 = vor.u32 %v1842_v5, %v1838_v0  ;;  %v364_v47 = vld [vmem:[%s3685_s23 + $0x88] sm:$0xf]  ;;  %v4033_v5 = vld [vmem:[#allocation2 + $0x5c] ss:$0 sps:$4 sm:$0x11]   ;;  %v4049_v27 = vcombine.low %v585_v20, %v4041_v21  ;;  %v1869_v11 = vshll.u32 %v4065_v50, 16 }
  0x73   : > { %1477 = vrot.lane.b32.xlu0 %v1336_v58, %s3627_s7  ;;  %v1860_v30 = vsel %vm763_vm3, %v1855_v14, %v1859_v16  ;;  %v3088_v58 = vcombine.low %v520_v40, %v4000_v45  ;;  %414 = vst.msk [vmem:[#allocation2 + $0x88] sm:$0xf] %vm378_vm0, %v364_v47  ;;  %v583_v14 = vld [vmem:[#allocation2 + $0x60] sm:$0xf]  ;;  %v4036_v16 = vld [vmem:[#allocation2 + $0x64] sm:$0xf]  ;;  %v1060_v63 = vsel %vm1036_vm2, %v1058_v1, %v1059_v2 }
  0x74   : > { %v1057_v22 = vsel %vm1036_vm2, %v1055_v3, %v1056_v4  ;;  %v4052_v29 = vcombine.low %v583_v14, %v4036_v16  ;;  %v1568_v42 = vrot.slane %v4033_v5, 1  ;;  %v367_v45 = vld [vmem:[%s3685_s23 + $0x94] sm:$0xf]  ;;  %v1874_v47 = vshrl.u32 %v4049_v27, 16  ;;  %418 = vst.msk [vmem:[#allocation2 + $0x98] sm:$0x1] %vm381_vm1, %v368_v53 }
  0x75   : > { %v1362_v13 = vshrl.u32 %v3088_v58, 16  ;;  %417 = vst.msk [vmem:[#allocation2 + $0x94] sm:$0xf] %vm378_vm0, %v367_v45  ;;  %v863_v2 = vshll.u32 %v4068_v41, 16  ;;  %v371_v3 = vld [vmem:[%s3685_s23 + $0xa4] sm:$0x1] }
  0x76   : > { %1607 = vrot.lane.b32.xlu1 %v1566_v6, %s3624_s26  ;;  %v1364_v6 = vshll.u32 %v3088_v58, 16  ;;  %v372_v4 = vld [vmem:[%s3685_s23 + $0xa8] sm:$0xf]  ;;  %421 = vst.msk [vmem:[#allocation2 + $0xa4] sm:$0x1] %vm381_vm1, %v371_v3  ;;  %v1871_v26 = vrot.slane %v1869_v11, 1 }
  0x77   : > { %1605 = vrot.lane.b32.xlu0 %v1563_v9, %s3624_s26  ;;  %v2078_v9 = vsel %vm1036_vm2, %v2076_v39, %v2077_v57  ;;  %v369_v39 = vld [vmem:[%s3685_s23 + $0x9c] sm:$0xf]  ;;  %v1881_v57 = vshll.u32 %v4057_v15, 16  ;;  %422 = vst.msk [vmem:[#allocation2 + $0xa8] sm:$0xf] %vm378_vm0, %v372_v4  ;;  %v865_v20 = vrot.slane %v863_v2, 1 }
  0x78   : > { %v1366_v18 = vrot.slane %v1364_v6, 1  ;;  %419 = vst.msk [vmem:[#allocation2 + $0x9c] sm:$0xf] %vm378_vm0, %v369_v39  ;;  %v1862_v6 = vshrl.u32 %v4052_v29, 16  ;;  %v4133_v53 = vld [vmem:[#allocation2 + $0x70] sm:$0xf] }
  0x79   : > { %v1883_v19 = vrot.slane %v1881_v57, 1  ;;  %v2083_v3 = vrot.slane %v4057_v15, 1 }
  0x7a   : > { %1719 = vrot.lane.b32.xlu1 %v3134_v38, %s3623_s25  ;;  %v1848_v38 = vsel %vm763_vm3, %v1843_v24, %v1847_v25  ;;  %v1357_v25 = vshll.u32 %v4033_v5, 16 }
  0x7b   : > { %1717 = vrot.lane.b32.xlu0 %v3133_v49, %s3623_s25  ;;  %v4005_v49 = vld [vmem:[#allocation2 + $0x58] sm:$0xf] }
  0x7c   : > { %v3087_v59 = vcombine.low %v518_v48, %v4005_v49  ;;  %v3119_v17 = vcombine.low %v560_v12, %v4005_v49  ;;  %v1359_v36 = vrot.slane %v1357_v25, 1  ;;  %v1876_v48 = vshll.u32 %v4049_v27, 16  ;;  %v374_v12 = vld [vmem:[%s3685_s23 + $0xb0] sm:$0x1] }
  0x7d   : > { %v1864_v49 = vshll.u32 %v4052_v29, 16  ;;  %424 = vst.msk [vmem:[#allocation2 + $0xb0] sm:$0x1] %vm381_vm1, %v374_v12 }
  0x7e   : > { %1991 = vrot.lane.b32.xlu1 %v1860_v30, %s3628_s8  ;;  %v1352_v0 = vshll.u32 %v3087_v59, 16  ;;  %v1350_v23 = vshrl.u32 %v3087_v59, 16  ;;  %v1367_v30 = vor.u32 %v1366_v18, %v1362_v13  ;;  %v1567_v40 = vrot.slane %v3119_v17, 1  ;;  %v375_v13 = vld [vmem:[%s3685_s23 + $0xb4] sm:$0xf] }
  0x7f   : > { %1989 = vrot.lane.b32.xlu0 %v1848_v38, %s3628_s8  ;;  %v366_v38 = vld [vmem:[%s3685_s23 + $0x90] sm:$0xf]  ;;  %v1878_v1 = vrot.slane %v1876_v48, 1  ;;  %v1866_v5 = vrot.slane %v1864_v49, 1  ;;  %425 = vst.msk [vmem:[#allocation2 + $0xb4] sm:$0xf] %vm378_vm0, %v375_v13 }
  0x80   : > { %v1354_v24 = vrot.slane %v1352_v0, 1  ;;  %416 = vst.msk [vmem:[#allocation2 + $0x90] sm:$0xf] %vm378_vm0, %v366_v38  ;;  %v1372_v51 = vsel %vm763_vm3, %v1367_v30, %v1371_v31  ;;  %v1569_v0 = vsel %vm1036_vm2, %v1567_v40, %v1568_v42  ;;  %v626_v30 = vld [vmem:[#allocation2 + $0x6c] sm:$0xe] }
  0x81   : > { %v1879_v18 = vor.u32 %v1878_v1, %v1874_v47  ;;  %v1867_v17 = vor.u32 %v1866_v5, %v1862_v6  ;;  %v498_v40 = vld [vmem:[#allocation2 + $0x6c] sm:$0xe]  ;;  %v3168_v49 = vcombine.low %v626_v30, %v4041_v21  ;;  %v4131_v47 = vld [vmem:[#allocation2 + $0x7c] sm:$0xf] }
  0x82   : > { %968 = vrot.lane.b32.xlu1 %v847_v52, %s3626_s6  ;;  %v1355_v34 = vor.u32 %v1354_v24, %v1350_v23  ;;  %v459_v52 = vld [vmem:[#allocation2 + $0x6c] sm:$0xf]  ;;  %v3534_v24 = vld [vmem:[#allocation2 + $0x74] ss:$0 sps:$4 sm:$0x11]  }
  0x83   : > { %2117 = vrot.lane.b32.xlu0 %v2075_v44, %s3629_s9  ;;  %v4078_v44 = vld [vmem:[#allocation2 + $0x70] sm:$0xf]  ;;  %v1884_v32 = vsel %vm763_vm3, %v1879_v18, %v1883_v19  ;;  %v880_v48 = vshll.u32 %v3534_v24, 16  ;;  %v2082_v2 = vrot.slane %v3168_v49, 1  ;;  %v1065_v6 = vrot.slane %v3534_v24, 1 }
  0x84   : > { %v1360_v55 = vsel %vm763_vm3, %v1355_v34, %v1359_v36  ;;  %v4096_v7 = vcombine.low %v459_v52, %v4078_v44  ;;  %v2080_v36 = vrot.slane %v4065_v50, 1  ;;  %v497_v50 = vld [vmem:[#allocation2 + $0x60] sm:$0xe]  ;;  %v522_v52 = vld [vmem:[#allocation2 + $0x6c] sm:$0xf] }
  0x85   : > { %v882_v39 = vrot.slane %v880_v48, 1  ;;  %v3073_v4 = vcombine.low %v497_v50, %v4055_v33  ;;  %v4154_v5 = vld [vmem:[#allocation2 + $0x80] ss:$0 sps:$4 sm:$0x11]   ;;  %v2084_v15 = vsel %vm1036_vm2, %v2082_v2, %v2083_v3  ;;  %v563_v18 = vld [vmem:[#allocation2 + $0x78] sm:$0xe] }
  0x86   : > { %970 = vrot.lane.b32.xlu1 %v859_v43, %s3626_s6  ;;  %v1572_v43 = vsel %vm1036_vm2, %v1570_v46, %v1571_v28  ;;  %v873_v45 = vshrl.u32 %v4096_v7, 16  ;;  %v524_v28 = vld [vmem:[#allocation2 + $0x78] sm:$0xf] }
  0x87   : > { %2119 = vrot.lane.b32.xlu0 %v2078_v9, %s3629_s9  ;;  %v373_v9 = vld [vmem:[%s3685_s23 + $0xac] sm:$0xf]  ;;  %v4141_v57 = vcombine.low %v524_v28, %v4131_v47  ;;  %v1061_v33 = vrot.slane %v3073_v4, 1  ;;  %v461_v28 = vld [vmem:[#allocation2 + $0x78] sm:$0xf] }
  0x88   : > { %423 = vst.msk [vmem:[#allocation2 + $0xac] sm:$0xf] %vm378_vm0, %v373_v9 }
  0x8a   : > { %1099 = vrot.lane.b32.xlu1 %v1060_v63, %s3625_s27  ;;  %v861_v63 = vshrl.u32 %v4068_v41, 16 }
  0x8b   : > { %1097 = vrot.lane.b32.xlu0 %v1057_v22, %s3625_s27 }
  0x8c   : > { %v866_v38 = vor.u32 %v865_v20, %v861_v63  ;;  %v562_v20 = vld [vmem:[#allocation2 + $0x6c] sm:$0xe] }
  0x8e   : > { %1211 = vrot.lane.b32.xlu1 %v3088_v58, %s3622_s24  ;;  %v625_v58 = vld [vmem:[#allocation2 + $0x60] sm:$0xe] }
  0x8f   : > { %1209 = vrot.lane.b32.xlu0 %v3087_v59, %s3622_s24  ;;  %v4083_v59 = vld [vmem:[#allocation2 + $0x68] ss:$0 sps:$4 sm:$0x11]   ;;  %v3167_v14 = vcombine.low %v625_v58, %v4036_v16  ;;  %v875_v16 = vshll.u32 %v4096_v7, 16 }
  0x90   : > { %v868_v22 = vshll.u32 %v4083_v59, 16  ;;  %v1062_v12 = vrot.slane %v4083_v59, 1  ;;  %v1386_v59 = vshrl.u32 %v4141_v57, 16 }
  0x91   : > { %v2079_v31 = vrot.slane %v3167_v14, 1  ;;  %v877_v46 = vrot.slane %v875_v16, 1  ;;  %v4159_v14 = vld [vmem:[#allocation2 + $0x74] ss:$0 sps:$4 sm:$0x11]  }
  0x92   : > { %1483 = vrot.lane.b32.xlu1 %v1372_v51, %s3627_s7  ;;  %v870_v34 = vrot.slane %v868_v22, 1  ;;  %v1063_v30 = vsel %vm1036_vm2, %v1061_v33, %v1062_v12  ;;  %v4214_v33 = vld [vmem:[#allocation2 + $0x8c] ss:$0 sps:$4 sm:$0x11]  }
  0x93   : > { %1481 = vrot.lane.b32.xlu0 %v1360_v55, %s3627_s7  ;;  %v3074_v55 = vcombine.low %v498_v40, %v4078_v44  ;;  %v878_v58 = vor.u32 %v877_v46, %v873_v45  ;;  %v4176_v45 = vld [vmem:[#allocation2 + $0x7c] sm:$0xf]  ;;  %v376_v46 = vld [vmem:[%s3685_s23 + $0xb8] sm:$0xf] }
  0x94   : > { %v871_v21 = vsel %vm763_vm3, %v866_v38, %v870_v34  ;;  %v589_v34 = vld [vmem:[#allocation2 + $0x84] sm:$0xf]  ;;  %v587_v38 = vld [vmem:[#allocation2 + $0x78] sm:$0xf]  ;;  %426 = vst.msk [vmem:[#allocation2 + $0xb8] sm:$0xf] %vm378_vm0, %v376_v46 }
  0x95   : > { %v1064_v44 = vrot.slane %v3074_v55, 1  ;;  %v883_v9 = vsel %vm763_vm3, %v878_v58, %v882_v39  ;;  %v4190_v55 = vld [vmem:[#allocation2 + $0x7c] sm:$0xf] }
  0x96   : > { %1611 = vrot.lane.b32.xlu1 %v1572_v43, %s3624_s26  ;;  %v4148_v43 = vcombine.low %v522_v52, %v4133_v53 }
  0x97   : > { %1609 = vrot.lane.b32.xlu0 %v1569_v0, %s3624_s26  ;;  %v4113_v23 = vpop.permute.xlu1 %1199  ;;  %v1388_v0 = vshll.u32 %v4141_v57, 16  ;;  %v1066_v19 = vsel %vm1036_vm2, %v1064_v44, %v1065_v6 }
  0x98   : > { %v1376_v13 = vshll.u32 %v4148_v43, 16  ;;  %v1374_v22 = vshrl.u32 %v4148_v43, 16 }
  0x99   : > { %v4116_v25 = vpop.permute.xlu0 %1197  ;;  %v1390_v16 = vrot.slane %v1388_v0, 1  ;;  %v4206_v0 = vcombine.low %v461_v28, %v4190_v55 }
  0x9a   : > { %1723 = vrot.lane.b32.xlu1 %v4049_v27, %s3623_s25  ;;  %v1872_v27 = vsel %vm763_vm3, %v1867_v17, %v1871_v26  ;;  %v1393_v17 = vshll.u32 %v4154_v5, 16 }
  0x9b   : > { %1721 = vrot.lane.b32.xlu0 %v4052_v29, %s3623_s25  ;;  %v4124_v42 = vpop.permute.xlu1 %1711  ;;  %v2081_v29 = vsel %vm1036_vm2, %v2079_v31, %v2080_v36  ;;  %v1378_v31 = vrot.slane %v1376_v13, 1  ;;  %v4173_v36 = vld [vmem:[#allocation2 + $0x88] sm:$0xf]  ;;  %v1391_v52 = vor.u32 %v1390_v16, %v1386_v59 }
  0x9d   : > { %v4128_v51 = vpop.permute.xlu0 %1709  ;;  %v1379_v58 = vor.u32 %v1378_v31, %v1374_v22 }
  0x9e   : > { %1995 = vrot.lane.b32.xlu1 %v1884_v32, %s3628_s8  ;;  %v1381_v32 = vshll.u32 %v4159_v14, 16 }
  0x9f   : > { %1993 = vrot.lane.b32.xlu0 %v1872_v27, %s3628_s8  ;;  %v3122_v27 = vcombine.low %v563_v18, %v4131_v47  ;;  %v4194_v47 = vcombine.low %v587_v38, %v4176_v45  ;;  %v4222_v18 = vld [vmem:[#allocation2 + $0x80] ss:$0 sps:$4 sm:$0x11]  }
  0xa0   : > { %v1086_v1 = vpop.permute.xlu1 %1085  ;;  %v1383_v39 = vrot.slane %v1381_v32, 1 }
  0xa1   : > { %v4143_v62 = vpop.permute.xlu0 %1597  ;;  %v1576_v6 = vrot.slane %v3122_v27, 1 }
  0xa2   : > { %972 = vrot.lane.b32.xlu1 %v871_v21, %s3626_s6  ;;  %v1384_v13 = vsel %vm763_vm3, %v1379_v58, %v1383_v39  ;;  %v429_v58 = vld [vmem:[%s4244_s20 + $0x4] sm:$0xf] }
  0xa3   : > { %2121 = vrot.lane.b32.xlu0 %v2081_v29, %s3629_s9  ;;  %v4188_v29 = vcombine.low %v589_v34, %v4173_v36  ;;  %v1886_v34 = vshrl.u32 %v4194_v47, 16  ;;  %v628_v39 = vld [vmem:[#allocation2 + $0x84] sm:$0xe]  ;;  %436 = vst.msk [vmem:[#allocation2 + $0xc4] sm:$0xf] %vm378_vm0, %v429_v58 }
  0xa4   : > { %v1088_v11 = vpop.permute.xlu1 %1087 }
  0xa5   : > { %v957_v63 = vpop.permute.xlu0 %956 }
  0xa6   : > { %974 = vrot.lane.b32.xlu1 %v883_v9, %s3626_s6  ;;  %v2143_v24 = vsel %vm2141_vm5, %v3767_v54, %v957_v63  ;;  %v3121_v54 = vcombine.low %v562_v20, %v4133_v53  ;;  %v1395_v53 = vrot.slane %v1393_v17, 1  ;;  %v1577_v9 = vrot.slane %v4154_v5, 1 }
  0xa7   : > { %2123 = vrot.lane.b32.xlu0 %v2084_v15, %s3629_s9  ;;  %v2176_v48 = vsel %vm2174_vm6, %v2143_v24, %v1086_v1  ;;  %v1900_v15 = vshll.u32 %v4188_v29, 16  ;;  %v1574_v63 = vrot.slane %v4159_v14, 1  ;;  %v627_v14 = vld [vmem:[#allocation2 + $0x78] sm:$0xe]  ;;  %v887_v24 = vshll.u32 %v4206_v0, 16 }
  0xa8   : > { %v4169_v26 = vpop.permute.xlu1 %1599  ;;  %v2209_v2 = vsel %vm2207_vm7, %v2176_v48, %v4116_v25  ;;  %v1573_v4 = vrot.slane %v3121_v54, 1  ;;  %v1396_v25 = vsel %vm763_vm3, %v1391_v52, %v1395_v53  ;;  %v1578_v22 = vsel %vm1036_vm2, %v1576_v6, %v1577_v9  ;;  %v4259_v52 = vld [vmem:[#allocation2 + $0x8c] ss:$0 sps:$4 sm:$0x11]   ;;  %v428_v53 = vld [vmem:[%s4244_s20] sm:$0xf] }
  0xa9   : > { %v959_v40 = vpop.permute.xlu0 %958  ;;  %v1898_v17 = vshrl.u32 %v4188_v29, 16  ;;  %v3169_v46 = vcombine.low %v627_v14, %v4176_v45  ;;  %v885_v48 = vshrl.u32 %v4206_v0, 16  ;;  %435 = vst.msk [vmem:[#allocation2 + $0xc0] sm:$0xf] %vm378_vm0, %v428_v53  ;;  %v430_v9 = vld [vmem:[%s4244_s20 + $0x8] sm:$0x1] }
  0xaa   : > { %v2145_v49 = vsel %vm2141_vm5, %v3770_v61, %v959_v40  ;;  %1103 = vrot.lane.b32.xlu1 %v1066_v19, %s3625_s27  ;;  %v377_v61 = vld [vmem:[%s3685_s23 + $0xbc] sm:$0x1]  ;;  %v4226_v19 = vld [vmem:[#allocation2 + $0x80] ss:$0 sps:$4 sm:$0x11]   ;;  %v1575_v32 = vsel %vm1036_vm2, %v1573_v4, %v1574_v63  ;;  %v1893_v40 = vshll.u32 %v4222_v18, 16 }
  0xab   : > { %v2178_v50 = vsel %vm2174_vm6, %v2145_v49, %v1088_v11  ;;  %1101 = vrot.lane.b32.xlu0 %v1063_v30, %s3625_s27  ;;  %427 = vst.msk [vmem:[#allocation2 + $0xbc] sm:$0x1] %vm381_vm1, %v377_v61  ;;  %v463_v11 = vld [vmem:[#allocation2 + $0x84] sm:$0xf]  ;;  %v1902_v30 = vrot.slane %v1900_v15, 1  ;;  %v892_v49 = vshll.u32 %v4226_v19, 16 }
  0xac   : > { %v1472_v21 = vpop.permute.xlu1 %1471  ;;  %v2211_v1 = vsel %vm2207_vm7, %v2178_v50, %v4113_v23  ;;  %v889_v50 = vrot.slane %v887_v24, 1  ;;  %v2085_v6 = vrot.slane %v3169_v46, 1  ;;  %437 = vst.msk [vmem:[#allocation2 + $0xc8] sm:$0x1] %vm381_vm1, %v430_v9  ;;  %v4288_v14 = vld [vmem:[#allocation2 + $0x94] sm:$0xf] }
  0xad   : > { %v1470_v3 = vpop.permute.xlu0 %1469  ;;  %v2244_v5 = vsel %vm2240_vm8, %v2211_v1, %v1472_v21  ;;  %v1903_v45 = vor.u32 %v1902_v30, %v1898_v17  ;;  %v432_v24 = vld [vmem:[%s4244_s20 + $0x10] sm:$0xf]  ;;  %v526_v17 = vld [vmem:[#allocation2 + $0x84] sm:$0xf]  ;;  %v527_v30 = vld [vmem:[#allocation2 + $0x88] sm:$0xf] }
  0xae   : > { %v2242_v44 = vsel %vm2240_vm8, %v2209_v2, %v1470_v3  ;;  %1215 = vrot.lane.b32.xlu1 %v4141_v57, %s3622_s24  ;;  %v4216_v57 = vld [vmem:[#allocation2 + $0x88] sm:$0xf]  ;;  %v2277_v16 = vsel %vm2273_vm9, %v2244_v5, %v4169_v26  ;;  %v1895_v2 = vrot.slane %v1893_v40, 1  ;;  %v500_v5 = vld [vmem:[#allocation2 + $0x84] sm:$0xe] }
  0xaf   : > { %v2275_v23 = vsel %vm2273_vm9, %v2242_v44, %v4143_v62  ;;  %1213 = vrot.lane.b32.xlu0 %v4148_v43, %s3622_s24  ;;  %v1888_v62 = vshll.u32 %v4194_v47, 16  ;;  %v4234_v59 = vcombine.low %v463_v11, %v4216_v57  ;;  %v2310_v27 = vsel %vm2306_vm10, %v2277_v16, %v4124_v42  ;;  %439 = vst.msk [vmem:[#allocation2 + $0xd0] sm:$0xf] %vm378_vm0, %v432_v24  ;;  %v593_v9 = vld [vmem:[#allocation2 + $0x9c] sm:$0xf] }
  0xb0   : > { %v1984_v12 = vpop.permute.xlu1 %1983  ;;  %v2308_v20 = vsel %vm2306_vm10, %v2275_v23, %v4128_v51  ;;  %v1905_v51 = vshll.u32 %v4214_v33, 16  ;;  %v894_v44 = vrot.slane %v892_v49, 1  ;;  %v890_v23 = vor.u32 %v889_v50, %v885_v48  ;;  %v564_v50 = vld [vmem:[#allocation2 + $0x84] sm:$0xe] }
  0xb1   : > { %v1982_v43 = vpop.permute.xlu0 %1981  ;;  %v1890_v26 = vrot.slane %v1888_v62, 1  ;;  %v899_v21 = vshll.u32 %v4234_v59, 16  ;;  %v2343_v3 = vsel %vm2339_vm11, %v2310_v27, %v1984_v12  ;;  %v897_v15 = vshrl.u32 %v4234_v59, 16  ;;  %v528_v62 = vld [vmem:[#allocation2 + $0x90] sm:$0xf] }
  0xb2   : > { %1487 = vrot.lane.b32.xlu1 %v1396_v25, %s3627_s7  ;;  %v2341_v54 = vsel %vm2339_vm11, %v2308_v20, %v1982_v43  ;;  %v1907_v61 = vrot.slane %v1905_v51, 1  ;;  %v2086_v25 = vrot.slane %v4222_v18, 1  ;;  %v431_v18 = vld [vmem:[%s4244_s20 + $0xc] sm:$0xf]  ;;  %v3170_v43 = vcombine.low %v628_v39, %v4173_v36 }
  0xb3   : > { %1485 = vrot.lane.b32.xlu0 %v1384_v13, %s3627_s7  ;;  %v1891_v1 = vor.u32 %v1890_v26, %v1886_v34  ;;  %v499_v13 = vld [vmem:[#allocation2 + $0x78] sm:$0xe]  ;;  %v901_v63 = vrot.slane %v899_v21, 1  ;;  %438 = vst.msk [vmem:[#allocation2 + $0xcc] sm:$0xf] %vm378_vm0, %v431_v18  ;;  %v895_v36 = vsel %vm763_vm3, %v890_v23, %v894_v44  ;;  %v3076_v51 = vcombine.low %v500_v5, %v4216_v57 }
  0xb4   : > { %v4246_v31 = vpop.permute.xlu1 %960  ;;  %v1908_v12 = vsel %vm763_vm3, %v1903_v45, %v1907_v61  ;;  %v3075_v26 = vcombine.low %v499_v13, %v4190_v55  ;;  %v3092_v40 = vcombine.low %v528_v62, %v4288_v14  ;;  %v2088_v46 = vrot.slane %v3170_v43, 1  ;;  %v3562_v21 = vld [vmem:[#allocation2 + $0x98] ss:$0 sps:$4 sm:$0x11]   ;;  %v4326_v62 = vld [vmem:[#allocation2 + $0x94] sm:$0xf] }
  0xb5   : > { %v2110_v38 = vpop.permute.xlu0 %2109  ;;  %v2089_v48 = vrot.slane %v4214_v33, 1  ;;  %v3091_v49 = vcombine.low %v526_v17, %v527_v30  ;;  %v1071_v57 = vrot.slane %v4259_v52, 1  ;;  %v1070_v53 = vrot.slane %v3076_v51, 1  ;;  %v4338_v51 = vld [vmem:[#allocation2 + $0x94] sm:$0xf] }
  0xb6   : > { %1615 = vrot.lane.b32.xlu1 %v1578_v22, %s3624_s26  ;;  %v2374_v28 = vsel %vm2372_vm12, %v2341_v54, %v2110_v38  ;;  %v1896_v22 = vsel %vm763_vm3, %v1891_v1, %v1895_v2  ;;  %v2087_v38 = vsel %vm1036_vm2, %v2085_v6, %v2086_v25  ;;  %v1067_v45 = vrot.slane %v3075_v26, 1  ;;  %v3563_v1 = vld [vmem:[#allocation2 + $0x8c] ss:$0 sps:$4 sm:$0x11]  }
  0xb7   : > { %1613 = vrot.lane.b32.xlu0 %v1575_v32, %s3624_s26  ;;  %3384 = vmatprep.mubr.msk.bf16.mxu0 %vm2425_vm13, %v2374_v28  ;;  %v902_v32 = vor.u32 %v901_v63, %v897_v15  ;;  %v1068_v28 = vrot.slane %v4226_v19, 1  ;;  %v1412_v61 = vshll.u32 %v3092_v40, 16  ;;  %v2090_v33 = vsel %vm1036_vm2, %v2088_v46, %v2089_v48  ;;  %v4340_v46 = vld [vmem:[#allocation2 + $0xa4] ss:$0 sps:$4 sm:$0x11]  }
  0xb8   : > { %v4267_v42 = vpop.permute.xlu1 %962  ;;  %v1400_v39 = vshll.u32 %v3091_v49, 16  ;;  %v1410_v19 = vshrl.u32 %v3092_v40, 16  ;;  %v1417_v6 = vshll.u32 %v3562_v21, 16  ;;  %v1398_v15 = vshrl.u32 %v3091_v49, 16 }
  0xb9   : > { %v2112_v4 = vpop.permute.xlu0 %2111  ;;  %v1414_v44 = vrot.slane %v1412_v61, 1  ;;  %v1069_v25 = vsel %vm1036_vm2, %v1067_v45, %v1068_v28  ;;  %v1405_v13 = vshll.u32 %v3563_v1, 16  ;;  %v1583_v26 = vrot.slane %v3562_v21, 1  ;;  %v467_v21 = vld [vmem:[#allocation2 + $0x9c] sm:$0xf] }
  0xba   : > { %v2376_v11 = vsel %vm2372_vm12, %v2343_v3, %v2112_v4  ;;  %1727 = vrot.lane.b32.xlu1 %v4188_v29, %s3623_s25  ;;  %v904_v29 = vshll.u32 %v4259_v52, 16  ;;  %v565_v52 = vld [vmem:[#allocation2 + $0x90] sm:$0xe]  ;;  %v1072_v3 = vsel %vm1036_vm2, %v1070_v53, %v1071_v57  ;;  %v3123_v4 = vcombine.low %v564_v50, %v527_v30  ;;  %v4349_v50 = vld [vmem:[#allocation2 + $0x98] ss:$0 sps:$4 sm:$0x11]  }
  0xbb   : > { %1725 = vrot.lane.b32.xlu0 %v4194_v47, %s3623_s25  ;;  %3385 = vmatmul.mubr.msk.bf16.vlgmr.msra.gmra.mrb[0].mxu0 %vm2425_vm13, %v2376_v11  ;;  %v433_v47 = vld [vmem:[%s4244_s20 + $0x14] sm:$0x1]  ;;  %v4320_v11 = vld [vmem:[#allocation2 + $0xa0] sm:$0xf]  ;;  %v1402_v5 = vrot.slane %v1400_v39, 1  ;;  %v3124_v63 = vcombine.low %v565_v52, %v4288_v14  ;;  %v1415_v43 = vor.u32 %v1414_v44, %v1410_v19  ;;  %v1407_v17 = vrot.slane %v1405_v13, 1 }
  0xbc   : > { %v4285_v20 = vpop.permute.xlu1 %1091  ;;  %440 = vst.msk [vmem:[#allocation2 + $0xd4] sm:$0x1] %vm381_vm1, %v433_v47  ;;  %v906_v34 = vrot.slane %v904_v29, 1  ;;  %v591_v29 = vld [vmem:[#allocation2 + $0x90] sm:$0xf]  ;;  %v4330_v18 = vcombine.low %v593_v9, %v4320_v11  ;;  %v1579_v30 = vrot.slane %v3123_v4, 1  ;;  %v2147_v57 = vsel %vm2141_vm5, %v3811_v37, %v4246_v31 }
  0xbd   : > { %v4293_v16 = vpop.permute.xlu0 %1089  ;;  %v1403_v47 = vor.u32 %v1402_v5, %v1398_v15  ;;  %v465_v14 = vld [vmem:[#allocation2 + $0x90] sm:$0xf]  ;;  %v1929_v52 = vshll.u32 %v4340_v46, 16  ;;  %v4369_v44 = vld [vmem:[#allocation2 + $0x98] ss:$0 sps:$4 sm:$0x11]  }
  0xbe   : > { %1999 = vrot.lane.b32.xlu1 %v1908_v12, %s3628_s8  ;;  %v907_v55 = vsel %vm763_vm3, %v902_v32, %v906_v34  ;;  %v1582_v34 = vrot.slane %v3124_v63, 1  ;;  %v1924_v48 = vshll.u32 %v4330_v18, 16  ;;  %v2180_v53 = vsel %vm2174_vm6, %v2147_v57, %v4293_v16  ;;  %v630_v57 = vld [vmem:[#allocation2 + $0x9c] sm:$0xe] }
  0xbf   : > { %1997 = vrot.lane.b32.xlu0 %v1896_v22, %s3628_s8  ;;  %v1419_v22 = vrot.slane %v1417_v6, 1  ;;  %v1922_v19 = vshrl.u32 %v4330_v18, 16  ;;  %v1917_v63 = vshll.u32 %v4349_v50, 16 }
  0xc0   : > { %v4303_v54 = vpop.permute.xlu1 %1203 }
  0xc1   : > { %v4307_v27 = vpop.permute.xlu0 %1201  ;;  %v1420_v28 = vsel %vm763_vm3, %v1415_v43, %v1419_v22  ;;  %v1931_v43 = vrot.slane %v1929_v52, 1  ;;  %v532_v52 = vld [vmem:[#allocation2 + $0xa8] sm:$0xf] }
  0xc2   : > { %976 = vrot.lane.b32.xlu1 %v895_v36, %s3626_s6  ;;  %v4336_v36 = vcombine.low %v591_v29, %v4326_v62  ;;  %v2213_v37 = vsel %vm2207_vm7, %v2180_v53, %v4307_v27  ;;  %v2149_v27 = vsel %vm2141_vm5, %v3826_v60, %v4267_v42 }
  0xc3   : > { %2125 = vrot.lane.b32.xlu0 %v2087_v38, %s3629_s9  ;;  %v1580_v38 = vrot.slane %v3563_v1, 1  ;;  %v629_v1 = vld [vmem:[#allocation2 + $0x90] sm:$0xe] }
  0xc4   : > { %v4314_v58 = vpop.permute.xlu1 %1475  ;;  %v1912_v61 = vshll.u32 %v4336_v36, 16  ;;  %v1910_v4 = vshrl.u32 %v4336_v36, 16  ;;  %v3171_v29 = vcombine.low %v629_v1, %v4326_v62 }
  0xc5   : > { %v1474_v2 = vpop.permute.xlu0 %1473  ;;  %v1581_v39 = vsel %vm1036_vm2, %v1579_v30, %v1580_v38  ;;  %v1919_v38 = vrot.slane %v1917_v63, 1  ;;  %v2095_v63 = vrot.slane %v4340_v46, 1 }
  0xc6   : > { %978 = vrot.lane.b32.xlu1 %v907_v55, %s3626_s6  ;;  %v4352_v55 = vcombine.low %v465_v14, %v4338_v51  ;;  %v2246_v16 = vsel %vm2240_vm8, %v2213_v37, %v1474_v2  ;;  %v1914_v13 = vrot.slane %v1912_v61, 1  ;;  %v4400_v14 = vld [vmem:[#allocation2 + $0xa4] ss:$0 sps:$4 sm:$0x11]  }
  0xc7   : > { %2127 = vrot.lane.b32.xlu0 %v2090_v33, %s3629_s9  ;;  %v4358_v33 = vld [vmem:[#allocation2 + $0xa0] sm:$0xf] }
  0xc8   : > { %v4322_v23 = vpop.permute.xlu1 %1603  ;;  %v911_v9 = vshll.u32 %v4352_v55, 16  ;;  %v4378_v2 = vcombine.low %v467_v21, %v4358_v33  ;;  %v2092_v21 = vrot.slane %v4349_v50, 1  ;;  %v4422_v50 = vld [vmem:[#allocation2 + $0xac] sm:$0xf] }
  0xc9   : > { %v1602_v12 = vpop.permute.xlu0 %1601 }
  0xca   : > { %1107 = vrot.lane.b32.xlu1 %v1072_v3, %s3625_s27  ;;  %v1926_v3 = vrot.slane %v1924_v48, 1  ;;  %v2279_v6 = vsel %vm2273_vm9, %v2246_v16, %v1602_v12  ;;  %v913_v62 = vrot.slane %v911_v9, 1 }
  0xcb   : > { %1105 = vrot.lane.b32.xlu0 %v1069_v25, %s3625_s27  ;;  %v2182_v25 = vsel %vm2174_vm6, %v2149_v27, %v4285_v20 }
  0xcc   : > { %v4333_v24 = vpop.permute.xlu1 %1715  ;;  %v2215_v60 = vsel %vm2207_vm7, %v2182_v25, %v4303_v54  ;;  %v909_v54 = vshrl.u32 %v4352_v55, 16  ;;  %v3094_v25 = vcombine.low %v532_v52, %v4422_v50 }
  0xcd   : > { %v1714_v32 = vpop.permute.xlu0 %1713  ;;  %v2248_v22 = vsel %vm2240_vm8, %v2215_v60, %v4314_v58  ;;  %v923_v58 = vshll.u32 %v4378_v2, 16 }
  0xce   : > { %1219 = vrot.lane.b32.xlu1 %v3092_v40, %s3622_s24  ;;  %v1408_v40 = vsel %vm763_vm3, %v1403_v47, %v1407_v17  ;;  %v2312_v15 = vsel %vm2306_vm10, %v2279_v6, %v1714_v32  ;;  %v1927_v47 = vor.u32 %v1926_v3, %v1922_v19  ;;  %v916_v17 = vshll.u32 %v4369_v44, 16  ;;  %v530_v19 = vld [vmem:[#allocation2 + $0x9c] sm:$0xf]  ;;  %v4426_v3 = vld [vmem:[#allocation2 + $0xa0] sm:$0xf] }
  0xcf   : > { %1217 = vrot.lane.b32.xlu0 %v3091_v49, %s3622_s24  ;;  %v1584_v49 = vsel %vm1036_vm2, %v1582_v34, %v1583_v26  ;;  %v2281_v30 = vsel %vm2273_vm9, %v2248_v22, %v4322_v23  ;;  %v1915_v26 = vor.u32 %v1914_v13, %v1910_v4  ;;  %v925_v37 = vrot.slane %v923_v58, 1  ;;  %v4445_v22 = vld [vmem:[#allocation2 + $0xb0] ss:$0 sps:$4 sm:$0x11]   ;;  %v567_v58 = vld [vmem:[#allocation2 + $0xa8] sm:$0xe] }
  0xd0   : > { %v1988_v45 = vpop.permute.xlu1 %1987  ;;  %v2314_v32 = vsel %vm2306_vm10, %v2281_v30, %v4333_v24  ;;  %v918_v61 = vrot.slane %v916_v17, 1  ;;  %v914_v24 = vor.u32 %v913_v62, %v909_v54  ;;  %v1074_v17 = vrot.slane %v4369_v44, 1  ;;  %v3579_v30 = vld [vmem:[#allocation2 + $0xa4] ss:$0 sps:$4 sm:$0x11]  }
  0xd1   : > { %v1986_v31 = vpop.permute.xlu0 %1985  ;;  %v2347_v23 = vsel %vm2339_vm11, %v2314_v32, %v1988_v45  ;;  %v921_v45 = vshrl.u32 %v4378_v2, 16  ;;  %v1920_v1 = vsel %vm763_vm3, %v1915_v26, %v1919_v38  ;;  %v566_v32 = vld [vmem:[#allocation2 + $0x9c] sm:$0xe]  ;;  %v1434_v26 = vshrl.u32 %v3094_v25, 16 }
  0xd2   : > { %1491 = vrot.lane.b32.xlu1 %v1420_v28, %s3627_s7  ;;  %v2345_v42 = vsel %vm2339_vm11, %v2312_v15, %v1986_v31  ;;  %v2091_v28 = vrot.slane %v3171_v29, 1  ;;  %v928_v31 = vshll.u32 %v4400_v14, 16 }
  0xd3   : > { %1489 = vrot.lane.b32.xlu0 %v1408_v40, %s3627_s7  ;;  %v1932_v40 = vsel %vm763_vm3, %v1927_v47, %v1931_v43  ;;  %v926_v6 = vor.u32 %v925_v37, %v921_v45  ;;  %v1077_v43 = vrot.slane %v4400_v14, 1  ;;  %v3125_v45 = vcombine.low %v566_v32, %v4426_v3  ;;  %v595_v37 = vld [vmem:[#allocation2 + $0xa8] sm:$0xf]  ;;  %v4502_v32 = vld [vmem:[#allocation2 + $0xb0] ss:$0 sps:$4 sm:$0x11]  }
  0xd4   : > { %v4383_v5 = vpop.permute.xlu1 %964  ;;  %v2093_v4 = vsel %vm1036_vm2, %v2091_v28, %v2092_v21  ;;  %v930_v9 = vrot.slane %v928_v31, 1  ;;  %v4462_v31 = vld [vmem:[#allocation2 + $0xac] sm:$0xf] }
  0xd5   : > { %v2114_v12 = vpop.permute.xlu0 %2113 }
  0xd6   : > { %v2378_v20 = vsel %vm2372_vm12, %v2345_v42, %v2114_v12  ;;  %1619 = vrot.lane.b32.xlu1 %v1584_v49, %s3624_s26  ;;  %v502_v49 = vld [vmem:[#allocation2 + $0x9c] sm:$0xe]  ;;  %v3093_v42 = vcombine.low %v530_v19, %v4426_v3  ;;  %v4473_v3 = vcombine.low %v595_v37, %v4462_v31  ;;  %v940_v37 = vshll.u32 %v4502_v32, 16 }
  0xd7   : > { %1617 = vrot.lane.b32.xlu0 %v1581_v39, %s3624_s26  ;;  %3388 = vmatprep.mubr.msk.bf16.mxu0 %vm2425_vm13, %v2378_v20  ;;  %v3172_v39 = vcombine.low %v630_v57, %v4320_v11  ;;  %v3078_v27 = vcombine.low %v502_v49, %v4358_v33  ;;  %v919_v11 = vsel %vm763_vm3, %v914_v24, %v918_v61  ;;  %v1436_v20 = vshll.u32 %v3094_v25, 16  ;;  %v4458_v61 = vld [vmem:[#allocation2 + $0xb8] sm:$0xf] }
  0xd8   : > { %v4405_v34 = vpop.permute.xlu1 %966  ;;  %v931_v33 = vsel %vm763_vm3, %v926_v6, %v930_v9  ;;  %v1424_v54 = vshll.u32 %v3093_v42, 16  ;;  %v1422_v28 = vshrl.u32 %v3093_v42, 16  ;;  %v3126_v24 = vcombine.low %v567_v58, %v4422_v50 }
  0xd9   : > { %v2116_v48 = vpop.permute.xlu0 %2115  ;;  %v2094_v13 = vrot.slane %v3172_v39, 1  ;;  %v1076_v29 = vrot.slane %v3078_v27, 1  ;;  %v1438_v38 = vrot.slane %v1436_v20, 1  ;;  %v1589_v50 = vrot.slane %v4445_v22, 1  ;;  %v4475_v27 = vld [vmem:[#allocation2 + $0xac] sm:$0xf] }
  0xda   : > { %v2380_v53 = vsel %vm2372_vm12, %v2347_v23, %v2116_v48  ;;  %1731 = vrot.lane.b32.xlu1 %v4330_v18, %s3623_s25  ;;  %v1441_v23 = vshll.u32 %v4445_v22, 16  ;;  %v597_v48 = vld [vmem:[#allocation2 + $0xb4] sm:$0xf]  ;;  %v1588_v6 = vrot.slane %v3126_v24, 1  ;;  %v1585_v9 = vrot.slane %v3125_v45, 1 }
  0xdb   : > { %1729 = vrot.lane.b32.xlu0 %v4336_v36, %s3623_s25  ;;  %3389 = vmatmul.mubr.msk.bf16.gmra.mrb[4].mxu0 %vm2425_vm13, %v2380_v53  ;;  %v501_v36 = vld [vmem:[#allocation2 + $0x90] sm:$0xe]  ;;  %v1078_v14 = vsel %vm1036_vm2, %v1076_v29, %v1077_v43  ;;  %v1426_v53 = vrot.slane %v1424_v54, 1  ;;  %v1439_v49 = vor.u32 %v1438_v38, %v1434_v26  ;;  %v471_v20 = vld [vmem:[#allocation2 + $0xb4] sm:$0xf]  ;;  %v1934_v24 = vshrl.u32 %v4473_v3, 16 }
  0xdc   : > { %v4419_v18 = vpop.permute.xlu1 %1095  ;;  %v3077_v60 = vcombine.low %v501_v36, %v4338_v51  ;;  %v2096_v51 = vsel %vm1036_vm2, %v2094_v13, %v2095_v63  ;;  %v1443_v39 = vrot.slane %v1441_v23, 1  ;;  %v1586_v13 = vrot.slane %v3579_v30, 1  ;;  %v4477_v63 = vld [vmem:[#allocation2 + $0xb0] ss:$0 sps:$4 sm:$0x11]  }
  0xdd   : > { %v4424_v16 = vpop.permute.xlu0 %1093  ;;  %v1427_v36 = vor.u32 %v1426_v53, %v1422_v28  ;;  %v1941_v58 = vshll.u32 %v4477_v63, 16  ;;  %v631_v38 = vld [vmem:[#allocation2 + $0xa8] sm:$0xe]  ;;  %v2153_v23 = vsel %vm2141_vm5, %v3880_v35, %v4405_v34 }
  0xde   : > { %2003 = vrot.lane.b32.xlu1 %v1932_v40, %s3628_s8  ;;  %v1073_v46 = vrot.slane %v3077_v60, 1  ;;  %v1429_v40 = vshll.u32 %v3579_v30, 16  ;;  %v4480_v60 = vld [vmem:[#allocation2 + $0xbc] ss:$0 sps:$4 sm:$0x11]   ;;  %v1444_v29 = vsel %vm763_vm3, %v1439_v49, %v1443_v39  ;;  %v1590_v30 = vsel %vm1036_vm2, %v1588_v6, %v1589_v50 }
  0xdf   : > { %2001 = vrot.lane.b32.xlu0 %v1920_v1, %s3628_s8  ;;  %v4467_v1 = vcombine.low %v597_v48, %v4458_v61  ;;  %v1587_v54 = vsel %vm1036_vm2, %v1585_v9, %v1586_v13  ;;  %v1953_v26 = vshll.u32 %v4480_v60, 16  ;;  %v2186_v28 = vsel %vm2174_vm6, %v2153_v23, %v4419_v18  ;;  %v4533_v50 = vld [vmem:[#allocation2 + $0xbc] ss:$0 sps:$4 sm:$0x11]  }
  0xe0   : > { %v4434_v15 = vpop.permute.xlu1 %1207  ;;  %v1075_v44 = vsel %vm1036_vm2, %v1073_v46, %v1074_v17  ;;  %v1431_v19 = vrot.slane %v1429_v40, 1  ;;  %v3173_v49 = vcombine.low %v631_v38, %v4462_v31  ;;  %v1943_v13 = vrot.slane %v1941_v58, 1  ;;  %v536_v58 = vld [vmem:[#allocation2 + $0xc0] sm:$0xf]  ;;  %v535_v38 = vld [vmem:[#allocation2 + $0xb8] sm:$0xf] }
  0xe1   : > { %v4439_v12 = vpop.permute.xlu0 %1205  ;;  %v1948_v43 = vshll.u32 %v4467_v1, 16  ;;  %v2219_v35 = vsel %vm2207_vm7, %v2186_v28, %v4434_v15 }
  0xe2   : > { %980 = vrot.lane.b32.xlu1 %v919_v11, %s3626_s6  ;;  %v1432_v17 = vsel %vm763_vm3, %v1427_v36, %v1431_v19  ;;  %v1955_v36 = vrot.slane %v1953_v26, 1  ;;  %v534_v26 = vld [vmem:[#allocation2 + $0xb4] sm:$0xf] }
  0xe3   : > { %2129 = vrot.lane.b32.xlu0 %v2093_v4, %s3629_s9  ;;  %v469_v4 = vld [vmem:[#allocation2 + $0xa8] sm:$0xf] }
  0xe4   : > { %v4447_v47 = vpop.permute.xlu1 %1479  ;;  %v4489_v22 = vcombine.low %v469_v4, %v4475_v27 }
  0xe5   : > { %v1478_v62 = vpop.permute.xlu0 %1477  ;;  %v2252_v18 = vsel %vm2240_vm8, %v2219_v35, %v4447_v47 }
  0xe6   : > { %982 = vrot.lane.b32.xlu1 %v931_v33, %s3626_s6  ;;  %v2151_v33 = vsel %vm2141_vm5, %v3870_v10, %v4383_v5  ;;  %v1936_v10 = vshll.u32 %v4473_v3, 16  ;;  %v933_v19 = vshrl.u32 %v4489_v22, 16 }
  0xe7   : > { %2131 = vrot.lane.b32.xlu0 %v2096_v51, %s3629_s9  ;;  %v4491_v51 = vld [vmem:[#allocation2 + $0xb8] sm:$0xf] }
  0xe8   : > { %v4455_v57 = vpop.permute.xlu1 %1607  ;;  %v1938_v45 = vrot.slane %v1936_v10, 1  ;;  %v952_v10 = vshll.u32 %v4533_v50, 16 }
  0xe9   : > { %v1606_v21 = vpop.permute.xlu0 %1605  ;;  %v2285_v15 = vsel %vm2273_vm9, %v2252_v18, %v4455_v57  ;;  %v632_v57 = vld [vmem:[#allocation2 + $0xb4] sm:$0xe]  ;;  %v1083_v18 = vrot.slane %v4533_v50, 1 }
  0xea   : > { %1111 = vrot.lane.b32.xlu1 %v1078_v14, %s3625_s27  ;;  %v1939_v9 = vor.u32 %v1938_v45, %v1934_v24  ;;  %v2101_v45 = vrot.slane %v4480_v60, 1 }
  0xeb   : > { %1109 = vrot.lane.b32.xlu0 %v1075_v44, %s3625_s27  ;;  %v1950_v44 = vrot.slane %v1948_v43, 1  ;;  %v942_v43 = vrot.slane %v940_v37, 1  ;;  %v4574_v37 = vld [vmem:[#allocation2 + $0xbc] ss:$0 sps:$4 sm:$0x11]  }
  0xec   : > { %v4469_v52 = vpop.permute.xlu1 %1719 }
  0xed   : > { %v1718_v11 = vpop.permute.xlu0 %1717 }
  0xee   : > { %1223 = vrot.lane.b32.xlu1 %v3094_v25, %s3622_s24  ;;  %v2184_v25 = vsel %vm2174_vm6, %v2151_v33, %v4424_v16  ;;  %v1946_v16 = vshrl.u32 %v4467_v1, 16 }
  0xef   : > { %1221 = vrot.lane.b32.xlu0 %v3093_v42, %s3622_s24  ;;  %v2217_v5 = vsel %vm2207_vm7, %v2184_v25, %v4439_v12  ;;  %v4509_v12 = vcombine.low %v471_v20, %v4491_v51  ;;  %v2097_v25 = vrot.slane %v3173_v49, 1 }
  0xf0   : > { %v1992_v46 = vpop.permute.xlu1 %1991  ;;  %v2250_v14 = vsel %vm2240_vm8, %v2217_v5, %v1478_v62  ;;  %v935_v62 = vshll.u32 %v4489_v22, 16  ;;  %v1951_v31 = vor.u32 %v1950_v44, %v1946_v16 }
  0xf1   : > { %v1990_v42 = vpop.permute.xlu0 %1989  ;;  %v2283_v48 = vsel %vm2273_vm9, %v2250_v14, %v1606_v21  ;;  %v947_v47 = vshll.u32 %v4509_v12, 16  ;;  %v945_v5 = vshrl.u32 %v4509_v12, 16  ;;  %v4559_v14 = vld [vmem:[#allocation2 + $0xc4] sm:$0xf] }
  0xf2   : > { %1495 = vrot.lane.b32.xlu1 %v1444_v29, %s3627_s7  ;;  %v2316_v53 = vsel %vm2306_vm10, %v2283_v48, %v1718_v11  ;;  %v937_v4 = vrot.slane %v935_v62, 1  ;;  %v2318_v11 = vsel %vm2306_vm10, %v2285_v15, %v4469_v52  ;;  %v1956_v52 = vsel %vm763_vm3, %v1951_v31, %v1955_v36 }
  0xf3   : > { %1493 = vrot.lane.b32.xlu0 %v1432_v17, %s3627_s7  ;;  %v2349_v34 = vsel %vm2339_vm11, %v2316_v53, %v1990_v42  ;;  %v2351_v33 = vsel %vm2339_vm11, %v2318_v11, %v1992_v46  ;;  %v2098_v17 = vrot.slane %v4477_v63, 1  ;;  %v949_v42 = vrot.slane %v947_v47, 1  ;;  %v504_v63 = vld [vmem:[#allocation2 + $0xb4] sm:$0xe]  ;;  %v569_v11 = vld [vmem:[#allocation2 + $0xc0] sm:$0xe] }
  0xf4   : > { %v4520_v40 = vpop.permute.xlu1 %968  ;;  %v938_v46 = vor.u32 %v937_v4, %v933_v19  ;;  %v954_v48 = vrot.slane %v952_v10, 1  ;;  %v3096_v28 = vcombine.low %v536_v58, %v4559_v14  ;;  %v1080_v15 = vrot.slane %v4502_v32, 1 }
  0xf5   : > { %v2118_v21 = vpop.permute.xlu0 %2117  ;;  %v2099_v23 = vsel %vm1036_vm2, %v2097_v25, %v2098_v17  ;;  %v950_v62 = vor.u32 %v949_v42, %v945_v5  ;;  %v1453_v47 = vshll.u32 %v4574_v37, 16  ;;  %v601_v25 = vld [vmem:[#allocation2 + $0xcc] sm:$0xf]  ;;  %v4590_v17 = vld [vmem:[#allocation2 + $0xd0] sm:$0xf] }
  0xf6   : > { %v2382_v39 = vsel %vm2372_vm12, %v2349_v34, %v2118_v21  ;;  %1623 = vrot.lane.b32.xlu1 %v1590_v30, %s3624_s26  ;;  %v943_v44 = vsel %vm763_vm3, %v938_v46, %v942_v43  ;;  %v3095_v34 = vcombine.low %v534_v26, %v535_v38  ;;  %v1460_v36 = vshll.u32 %v3096_v28, 16  ;;  %v599_v46 = vld [vmem:[#allocation2 + $0xc0] sm:$0xf]  ;;  %v4593_v5 = vld [vmem:[#allocation2 + $0xc4] sm:$0xf] }
  0xf7   : > { %1621 = vrot.lane.b32.xlu0 %v1587_v54, %s3624_s26  ;;  %3392 = vmatprep.mubr.msk.bf16.mxu0 %vm2425_vm13, %v2382_v39  ;;  %v3174_v54 = vcombine.low %v632_v57, %v4458_v61  ;;  %v3080_v61 = vcombine.low %v504_v63, %v4491_v51  ;;  %v955_v49 = vsel %vm763_vm3, %v950_v62, %v954_v48  ;;  %v3592_v39 = vld [vmem:[#allocation2 + $0xc8] ss:$0 sps:$4 sm:$0x11]   ;;  %v1455_v26 = vrot.slane %v1453_v47, 1 }
  0xf8   : > { %v4542_v6 = vpop.permute.xlu1 %970  ;;  %v1448_v31 = vshll.u32 %v3095_v34, 16  ;;  %v1446_v32 = vshrl.u32 %v3095_v34, 16  ;;  %v3144_v63 = vcombine.low %v601_v25, %v4590_v17 }
  0xf9   : > { %v2120_v29 = vpop.permute.xlu0 %2119  ;;  %v2100_v24 = vrot.slane %v3174_v54, 1  ;;  %v1082_v51 = vrot.slane %v3080_v61, 1  ;;  %v1592_v61 = vrot.slane %v4574_v37, 1 }
  0xfa   : > { %v2384_v20 = vsel %vm2372_vm12, %v2351_v33, %v2120_v29  ;;  %1735 = vrot.lane.b32.xlu1 %v4467_v1, %s3623_s25  ;;  %v1944_v1 = vsel %vm763_vm3, %v1939_v9, %v1943_v13  ;;  %v1458_v9 = vshrl.u32 %v3096_v28, 16  ;;  %v1462_v13 = vrot.slane %v1460_v36, 1  ;;  %v568_v29 = vld [vmem:[#allocation2 + $0xb4] sm:$0xe] }
  0xfb   : > { %1733 = vrot.lane.b32.xlu0 %v4473_v3, %s3623_s25  ;;  %3393 = vmatmul.mubr.msk.bf16.gmra.mrb[8].mxu0 %vm2425_vm13, %v2384_v20  ;;  %v503_v3 = vld [vmem:[#allocation2 + $0xa8] sm:$0xe]  ;;  %v2102_v60 = vsel %vm1036_vm2, %v2100_v24, %v2101_v45  ;;  %v1084_v50 = vsel %vm1036_vm2, %v1082_v51, %v1083_v18  ;;  %v1465_v33 = vshll.u32 %v3592_v39, 16  ;;  %v1450_v20 = vrot.slane %v1448_v31, 1 }
  0xfc   : > { %v4555_v30 = vpop.permute.xlu1 %1099  ;;  %v3079_v35 = vcombine.low %v503_v3, %v4475_v27  ;;  %v3127_v42 = vcombine.low %v568_v29, %v535_v38  ;;  %v4601_v38 = vld [vmem:[#allocation2 + $0xd4] ss:$0 sps:$4 sm:$0x11]   ;;  %v2155_v24 = vsel %vm2141_vm5, %v3963_v56, %v4520_v40  ;;  %v3597_v18 = vld [vmem:[#allocation2 + $0xc8] ss:$0 sps:$4 sm:$0x11]  }
  0xfd   : > { %v4561_v16 = vpop.permute.xlu0 %1097  ;;  %v1467_v54 = vrot.slane %v1465_v33, 1  ;;  %v1451_v3 = vor.u32 %v1450_v20, %v1446_v32  ;;  %v633_v29 = vld [vmem:[#allocation2 + $0xc0] sm:$0xe] }
  0xfe   : > { %2007 = vrot.lane.b32.xlu1 %v1956_v52, %s3628_s8  ;;  %v1079_v27 = vrot.slane %v3079_v35, 1  ;;  %v3128_v52 = vcombine.low %v569_v11, %v4559_v14  ;;  %v1595_v14 = vrot.slane %v3592_v39, 1  ;;  %v1591_v62 = vrot.slane %v3127_v42, 1 }
  0xff   : > { %2005 = vrot.lane.b32.xlu0 %v1944_v1, %s3628_s8  ;;  %v1463_v1 = vor.u32 %v1462_v13, %v1458_v9  ;;  %v1972_v35 = vshll.u32 %v3144_v63, 16  ;;  %v1965_v9 = vshll.u32 %v3597_v18, 16  ;;  %v634_v13 = vld [vmem:[#allocation2 + $0xcc] sm:$0xe]  ;;  %v3175_v42 = vcombine.low %v633_v29, %v4593_v5 }
 0x100   : > { %v4569_v53 = vpop.permute.xlu1 %1211  ;;  %v1081_v57 = vsel %vm1036_vm2, %v1079_v27, %v1080_v15  ;;  %v1593_v40 = vsel %vm1036_vm2, %v1591_v62, %v1592_v61  ;;  %v3176_v25 = vcombine.low %v634_v13, %v4590_v17 }
 0x101   : > { %v1210_v21 = vpop.permute.xlu0 %1209  ;;  %v1468_v45 = vsel %vm763_vm3, %v1463_v1, %v1467_v54  ;;  %v1974_v31 = vrot.slane %v1972_v35, 1 }
 0x102   : > { %984 = vrot.lane.b32.xlu1 %v943_v44, %s3626_s6  ;;  %v1594_v44 = vrot.slane %v3128_v52, 1 }
 0x103   : > { %2133 = vrot.lane.b32.xlu0 %v2099_v23, %s3629_s9  ;;  %v3143_v23 = vcombine.low %v599_v46, %v4593_v5  ;;  %v2103_v5 = vrot.slane %v3175_v42, 1 }
 0x104   : > { %v4579_v19 = vpop.permute.xlu1 %1483 }
 0x105   : > { %v1482_v4 = vpop.permute.xlu0 %1481  ;;  %v1960_v39 = vshll.u32 %v3143_v23, 16  ;;  %v1958_v27 = vshrl.u32 %v3143_v23, 16 }
 0x106   : > { %986 = vrot.lane.b32.xlu1 %v955_v49, %s3626_s6  ;;  %v2188_v49 = vsel %vm2174_vm6, %v2155_v24, %v4561_v16  ;;  %v2157_v16 = vsel %vm2141_vm5, %v3977_v8, %v4542_v6 }
 0x107   : > { %2135 = vrot.lane.b32.xlu0 %v2102_v60, %s3629_s9  ;;  %v2221_v37 = vsel %vm2207_vm7, %v2188_v49, %v1210_v21  ;;  %v1596_v60 = vsel %vm1036_vm2, %v1594_v44, %v1595_v14  ;;  %v1970_v21 = vshrl.u32 %v3144_v63, 16  ;;  %v2104_v44 = vrot.slane %v3597_v18, 1 }
 0x108   : > { %v4587_v43 = vpop.permute.xlu1 %1611  ;;  %v2254_v56 = vsel %vm2240_vm8, %v2221_v37, %v1482_v4  ;;  %v2190_v4 = vsel %vm2174_vm6, %v2157_v16, %v4555_v30 }
 0x109   : > { %v1610_v10 = vpop.permute.xlu0 %1609  ;;  %v2223_v33 = vsel %vm2207_vm7, %v2190_v4, %v4569_v53  ;;  %v1975_v20 = vor.u32 %v1974_v31, %v1970_v21  ;;  %v2105_v62 = vsel %vm1036_vm2, %v2103_v5, %v2104_v44 }
 0x10a   : > { %1115 = vrot.lane.b32.xlu1 %v1084_v50, %s3625_s27  ;;  %v2287_v15 = vsel %vm2273_vm9, %v2254_v56, %v1610_v10  ;;  %v1962_v50 = vrot.slane %v1960_v39, 1 }
 0x10b   : > { %1113 = vrot.lane.b32.xlu0 %v1081_v57, %s3625_s27  ;;  %v2256_v57 = vsel %vm2240_vm8, %v2223_v33, %v4579_v19  ;;  %v1967_v19 = vrot.slane %v1965_v9, 1 }
 0x10c   : > { %v1724_v58 = vpop.permute.xlu1 %1723  ;;  %v2289_v30 = vsel %vm2273_vm9, %v2256_v57, %v4587_v43  ;;  %v1963_v46 = vor.u32 %v1962_v50, %v1958_v27 }
 0x10d   : > { %v1722_v48 = vpop.permute.xlu0 %1721  ;;  %v2322_v10 = vsel %vm2306_vm10, %v2289_v30, %v1724_v58  ;;  %v2107_v58 = vrot.slane %v4601_v38, 1 }
 0x10e   : > { %1227 = vrot.lane.b32.xlu1 %v3096_v28, %s3622_s24  ;;  %v1456_v28 = vsel %vm763_vm3, %v1451_v3, %v1455_v26  ;;  %v2320_v47 = vsel %vm2306_vm10, %v2287_v15, %v1722_v48  ;;  %v2106_v3 = vrot.slane %v3176_v25, 1  ;;  %v1968_v48 = vsel %vm763_vm3, %v1963_v46, %v1967_v19 }
 0x10f   : > { %1225 = vrot.lane.b32.xlu0 %v3095_v34, %s3622_s24  ;;  %v1977_v34 = vshll.u32 %v4601_v38, 16  ;;  %s4727_s24 = scalar_lea.vmem %s4771_s3, %s3031_s22 }
 0x110   : > { %v1996_v51 = vpop.permute.xlu1 %1995 }
 0x111   : > { %v1994_v36 = vpop.permute.xlu0 %1993  ;;  %v1979_v53 = vrot.slane %v1977_v34, 1  ;;  %v2355_v1 = vsel %vm2339_vm11, %v2322_v10, %v1996_v51 }
 0x112   : > { %1499 = vrot.lane.b32.xlu1 %v1468_v45, %s3627_s7  ;;  %v2353_v8 = vsel %vm2339_vm11, %v2320_v47, %v1994_v36 }
 0x113   : > { %1497 = vrot.lane.b32.xlu0 %v1456_v28, %s3627_s7  ;;  %v1980_v17 = vsel %vm763_vm3, %v1975_v20, %v1979_v53 }
 0x114   : > { %v973_v11 = vpop.permute.xlu1 %972 }
 0x115   : > { %v2122_v6 = vpop.permute.xlu0 %2121  ;;  %v2159_v28 = vsel %vm2141_vm5, %v4068_v41, %v973_v11 }
 0x116   : > { %v2386_v32 = vsel %vm2372_vm12, %v2353_v8, %v2122_v6  ;;  %1627 = vrot.lane.b32.xlu1 %v1596_v60, %s3624_s26 }
 0x117   : > { %1625 = vrot.lane.b32.xlu0 %v1593_v40, %s3624_s26  ;;  %3396 = vmatprep.mubr.msk.bf16.mxu0 %vm2425_vm13, %v2386_v32 }
 0x118   : > { %v975_v52 = vpop.permute.xlu1 %974 }
 0x119   : > { %v2124_v54 = vpop.permute.xlu0 %2123  ;;  %v2161_v56 = vsel %vm2141_vm5, %v4096_v7, %v975_v52 }
 0x11a   : > { %v2388_v43 = vsel %vm2372_vm12, %v2355_v1, %v2124_v54  ;;  %1739 = vrot.lane.b32.xlu1 %v3144_v63, %s3623_s25  ;;  %v2108_v63 = vsel %vm1036_vm2, %v2106_v3, %v2107_v58 }
 0x11b   : > { %1737 = vrot.lane.b32.xlu0 %v3143_v23, %s3623_s25  ;;  %3397 = vmatmul.mubr.msk.bf16.gmra.mrb[12].mxu0 %vm2425_vm13, %v2388_v43  ;;  %s3032_s25 = sshll.u32 %s3677_s19, 3 }
 0x11c   : > { %v1104_v26 = vpop.permute.xlu1 %1103  ;;  %s327_s28 = scalar_lea.vmem %s4772_s4, %s3032_s25 }
 0x11d   : > { %v1102_v14 = vpop.permute.xlu0 %1101  ;;  %v2194_v34 = vsel %vm2174_vm6, %v2161_v56, %v1104_v26 }
 0x11e   : > { %2011 = vrot.lane.b32.xlu1 %v1980_v17, %s3628_s8  ;;  %v2192_v18 = vsel %vm2174_vm6, %v2159_v28, %v1102_v14 }
 0x11f   : > { %2009 = vrot.lane.b32.xlu0 %v1968_v48, %s3628_s8 }
 0x120   : > { %v1216_v23 = vpop.permute.xlu1 %1215 }
 0x121   : > { %v1214_v61 = vpop.permute.xlu0 %1213  ;;  %v2227_v41 = vsel %vm2207_vm7, %v2194_v34, %v1216_v23 }
 0x122   : > { %2139 = vrot.lane.b32.xlu1 %v2108_v63, %s3629_s9  ;;  %v2225_v37 = vsel %vm2207_vm7, %v2192_v18, %v1214_v61 }
 0x123   : > { %2137 = vrot.lane.b32.xlu0 %v2105_v62, %s3629_s9 }
 0x124   : > { %v1488_v38 = vpop.permute.xlu1 %1487 }
 0x125   : > { %v1486_v24 = vpop.permute.xlu0 %1485  ;;  %v2260_v31 = vsel %vm2240_vm8, %v2227_v41, %v1488_v38 }
 0x126   : > { %v2258_v60 = vsel %vm2240_vm8, %v2225_v37, %v1486_v24 }
 0x128   : > { %v1616_v45 = vpop.permute.xlu1 %1615 }
 0x129   : > { %v1614_v35 = vpop.permute.xlu0 %1613  ;;  %v2293_v47 = vsel %vm2273_vm9, %v2260_v31, %v1616_v45 }
 0x12a   : > { %v2291_v40 = vsel %vm2273_vm9, %v2258_v60, %v1614_v35 }
 0x12c   : > { %v1728_v49 = vpop.permute.xlu1 %1727 }
 0x12d   : > { %v1726_v51 = vpop.permute.xlu0 %1725  ;;  %v2326_v7 = vsel %vm2306_vm10, %v2293_v47, %v1728_v49 }
 0x12e   : > { %v2324_v27 = vsel %vm2306_vm10, %v2291_v40, %v1726_v51 }
 0x130   : > { %v2000_v39 = vpop.permute.xlu1 %1999 }
 0x131   : > { %v1998_v36 = vpop.permute.xlu0 %1997  ;;  %v2359_v50 = vsel %vm2339_vm11, %v2326_v7, %v2000_v39 }
 0x132   : > { %v2357_v15 = vsel %vm2339_vm11, %v2324_v27, %v1998_v36 }
 0x134   : > { %v977_v16 = vpop.permute.xlu1 %976 }
 0x135   : > { %v2126_v21 = vpop.permute.xlu0 %2125  ;;  %v2163_v10 = vsel %vm2141_vm5, %v4206_v0, %v977_v16 }
 0x136   : > { %v2390_v4 = vsel %vm2372_vm12, %v2357_v15, %v2126_v21 }
 0x137   : > { %3400 = vmatprep.mubr.msk.bf16.mxu1 %vm2425_vm13, %v2390_v4 }
 0x138   : > { %v979_v11 = vpop.permute.xlu1 %978 }
 0x139   : > { %v2128_v9 = vpop.permute.xlu0 %2127  ;;  %v2165_v54 = vsel %vm2141_vm5, %v4234_v59, %v979_v11 }
 0x13a   : > { %v2392_v13 = vsel %vm2372_vm12, %v2359_v50, %v2128_v9 }
 0x13b   : > { %3401 = vmatmul.mubr.msk.bf16.vlgmr.msra.gmra.mrb[0].mxu1 %vm2425_vm13, %v2392_v13 }
 0x13c   : > { %v1108_v33 = vpop.permute.xlu1 %1107 }
 0x13d   : > { %v1106_v8 = vpop.permute.xlu0 %1105  ;;  %v2198_v17 = vsel %vm2174_vm6, %v2165_v54, %v1108_v33 }
 0x13e   : > { %v2196_v52 = vsel %vm2174_vm6, %v2163_v10, %v1106_v8 }
 0x140   : > { %v1220_v6 = vpop.permute.xlu1 %1219 }
 0x141   : > { %v1218_v29 = vpop.permute.xlu0 %1217  ;;  %v2231_v0 = vsel %vm2207_vm7, %v2198_v17, %v1220_v6 }
 0x142   : > { %v2229_v19 = vsel %vm2207_vm7, %v2196_v52, %v1218_v29 }
 0x144   : > { %v1492_v57 = vpop.permute.xlu1 %1491 }
 0x145   : > { %v1490_v32 = vpop.permute.xlu0 %1489  ;;  %v2264_v5 = vsel %vm2240_vm8, %v2231_v0, %v1492_v57 }
 0x146   : > { %v2262_v1 = vsel %vm2240_vm8, %v2229_v19, %v1490_v32 }
 0x148   : > { %v1620_v30 = vpop.permute.xlu1 %1619 }
 0x149   : > { %v1618_v20 = vpop.permute.xlu0 %1617  ;;  %v2297_v14 = vsel %vm2273_vm9, %v2264_v5, %v1620_v30 }
 0x14a   : > { %v2295_v43 = vsel %vm2273_vm9, %v2262_v1, %v1618_v20 }
 0x14c   : > { %v1732_v53 = vpop.permute.xlu1 %1731 }
 0x14d   : > { %v1730_v25 = vpop.permute.xlu0 %1729  ;;  %v2330_v59 = vsel %vm2306_vm10, %v2297_v14, %v1732_v53 }
 0x14e   : > { %v2328_v3 = vsel %vm2306_vm10, %v2295_v43, %v1730_v25 }
 0x150   : > { %v2004_v46 = vpop.permute.xlu1 %2003 }
 0x151   : > { %v2002_v42 = vpop.permute.xlu0 %2001  ;;  %v2363_v23 = vsel %vm2339_vm11, %v2330_v59, %v2004_v46 }
 0x152   : > { %v2361_v26 = vsel %vm2339_vm11, %v2328_v3, %v2002_v42 }
 0x154   : > { %v981_v58 = vpop.permute.xlu1 %980 }
 0x155   : > { %v2130_v48 = vpop.permute.xlu0 %2129  ;;  %v2167_v36 = vsel %vm2141_vm5, %v4352_v55, %v981_v58 }
 0x156   : > { %v2394_v44 = vsel %vm2372_vm12, %v2361_v26, %v2130_v48 }
 0x157   : > { %3404 = vmatprep.mubr.msk.bf16.mxu1 %vm2425_vm13, %v2394_v44 }
 0x158   : > { %v983_v63 = vpop.permute.xlu1 %982 }
 0x159   : > { %v2132_v62 = vpop.permute.xlu0 %2131  ;;  %v2169_v16 = vsel %vm2141_vm5, %v4378_v2, %v983_v63 }
 0x15a   : > { %v2396_v61 = vsel %vm2372_vm12, %v2363_v23, %v2132_v62 }
 0x15b   : > { %3405 = vmatmul.mubr.msk.bf16.gmra.mrb[4].mxu1 %vm2425_vm13, %v2396_v61 }
 0x15c   : > { %v1112_v38 = vpop.permute.xlu1 %1111 }
 0x15d   : > { %v1110_v24 = vpop.permute.xlu0 %1109  ;;  %v2202_v15 = vsel %vm2174_vm6, %v2169_v16, %v1112_v38 }
 0x15e   : > { %v2200_v60 = vsel %vm2174_vm6, %v2167_v36, %v1110_v24 }
 0x160   : > { %v1224_v45 = vpop.permute.xlu1 %1223 }
 0x161   : > { %v1222_v35 = vpop.permute.xlu0 %1221  ;;  %v2235_v55 = vsel %vm2207_vm7, %v2202_v15, %v1224_v45 }
 0x162   : > { %v2233_v40 = vsel %vm2207_vm7, %v2200_v60, %v1222_v35 }
 0x164   : > { %v1496_v49 = vpop.permute.xlu1 %1495 }
 0x165   : > { %v1494_v51 = vpop.permute.xlu0 %1493  ;;  %v2268_v7 = vsel %vm2240_vm8, %v2235_v55, %v1496_v49 }
 0x166   : > { %v2266_v27 = vsel %vm2240_vm8, %v2233_v40, %v1494_v51 }
 0x168   : > { %v1624_v28 = vpop.permute.xlu1 %1623 }
 0x169   : > { %v1622_v18 = vpop.permute.xlu0 %1621  ;;  %v2301_v50 = vsel %vm2273_vm9, %v2268_v7, %v1624_v28 }
 0x16a   : > { %v2299_v41 = vsel %vm2273_vm9, %v2266_v27, %v1622_v18 }
 0x16c   : > { %v1736_v39 = vpop.permute.xlu1 %1735 }
 0x16d   : > { %v1734_v37 = vpop.permute.xlu0 %1733  ;;  %v2334_v2 = vsel %vm2306_vm10, %v2301_v50, %v1736_v39 }
 0x16e   : > { %v2332_v21 = vsel %vm2306_vm10, %v2299_v41, %v1734_v37 }
 0x170   : > { %v2008_v56 = vpop.permute.xlu1 %2007 }
 0x171   : > { %v2006_v34 = vpop.permute.xlu0 %2005  ;;  %v2367_v13 = vsel %vm2339_vm11, %v2334_v2, %v2008_v56 }
 0x172   : > { %v2365_v4 = vsel %vm2339_vm11, %v2332_v21, %v2006_v34 }
 0x174   : > { %v985_v31 = vpop.permute.xlu1 %984 }
 0x175   : > { %v2134_v47 = vpop.permute.xlu0 %2133  ;;  %v2171_v52 = vsel %vm2141_vm5, %v4489_v22, %v985_v31 }
 0x176   : > { %v2398_v11 = vsel %vm2372_vm12, %v2365_v4, %v2134_v47 }
 0x177   : > { %3408 = vmatprep.mubr.msk.bf16.mxu1 %vm2425_vm13, %v2398_v11 }
 0x178   : > { %v987_v9 = vpop.permute.xlu1 %986 }
 0x179   : > { %v2136_v33 = vpop.permute.xlu0 %2135  ;;  %v2173_v46 = vsel %vm2141_vm5, %v4509_v12, %v987_v9 }
 0x17a   : > { %v2400_v8 = vsel %vm2372_vm12, %v2367_v13, %v2136_v33 }
 0x17b   : > { %3409 = vmatmul.mubr.msk.bf16.gmra.mrb[8].mxu1 %vm2425_vm13, %v2400_v8 }
 0x17c   : > { %v1116_v6 = vpop.permute.xlu1 %1115 }
 0x17d   : > { %v1114_v29 = vpop.permute.xlu0 %1113  ;;  %v2206_v42 = vsel %vm2174_vm6, %v2173_v46, %v1116_v6 }
 0x17e   : > { %v2204_v1 = vsel %vm2174_vm6, %v2171_v52, %v1114_v29 }
 0x180   : > { %v1228_v57 = vpop.permute.xlu1 %1227 }
 0x181   : > { %v1226_v32 = vpop.permute.xlu0 %1225  ;;  %v2239_v43 = vsel %vm2207_vm7, %v2206_v42, %v1228_v57 }
 0x182   : > { %v2237_v17 = vsel %vm2207_vm7, %v2204_v1, %v1226_v32 }
 0x184   : > { %v1500_v30 = vpop.permute.xlu1 %1499 }
 0x185   : > { %v1498_v20 = vpop.permute.xlu0 %1497  ;;  %v2272_v58 = vsel %vm2240_vm8, %v2239_v43, %v1500_v30 }
 0x186   : > { %v2270_v0 = vsel %vm2240_vm8, %v2237_v17, %v1498_v20 }
 0x188   : > { %v1628_v53 = vpop.permute.xlu1 %1627 }
 0x189   : > { %v1626_v25 = vpop.permute.xlu0 %1625  ;;  %v2305_v26 = vsel %vm2273_vm9, %v2272_v58, %v1628_v53 }
 0x18a   : > { %v2303_v48 = vsel %vm2273_vm9, %v2270_v0, %v1626_v25 }
 0x18c   : > { %v1740_v10 = vpop.permute.xlu1 %1739 }
 0x18d   : > { %v1738_v19 = vpop.permute.xlu0 %1737  ;;  %v2338_v61 = vsel %vm2306_vm10, %v2305_v26, %v1740_v10 }
 0x18e   : > { %v3386_v54 = vpop.f32.mrb[0].mxu0  ;;  %v2336_v38 = vsel %vm2306_vm10, %v2303_v48, %v1738_v19 }
 0x18f   : > { %v2496_v3 = vpop.f32.mrb[1].mxu0  ;;  %v2823_v24 = vmul.f32 %v3386_v54, %v3386_v54 }
 0x190   : > { %v3387_v22 = vpop.f32.mrb[2].mxu0  ;;  %v2012_v12 = vpop.permute.xlu1 %2011  ;;  %v2821_v59 = vmul.f32 %v2496_v3, %v2496_v3 }
 0x191   : > { %v3272_v5 = vpack.c.bf16 %v3387_v22, %v3386_v54  ;;  %v2499_v44 = vpop.f32.mrb[3].mxu0  ;;  %v2010_v14 = vpop.permute.xlu0 %2009  ;;  %v2371_v45 = vsel %vm2339_vm11, %v2338_v61, %v2012_v12  ;;  %v2824_v37 = vmul.f32 %v3387_v22, %v3387_v22 }
 0x192   : > { %v3267_v63 = vpack.c.bf16 %v2499_v44, %v2496_v3  ;;  %v2783_v23 = vadd.f32 %v2499_v44, %v2496_v3  ;;  %v2822_v62 = vmul.f32 %v2499_v44, %v2499_v44  ;;  %v2369_v28 = vsel %vm2339_vm11, %v2336_v38, %v2010_v14 }
 0x193   : > { %3344 = vst [vmem:[%s4727_s24 + $0x8] sm:$0xff] %v3272_v5  }
 0x194   : > { %3268 = vst [vmem:[%s4727_s24] sm:$0xff] %v3267_v63   ;;  %v2784_v35 = vadd.f32 %v3386_v54, %v2783_v23  ;;  %v2853_v49 = vadd.f32 %v2822_v62, %v2821_v59  ;;  %v2140_v51 = vpop.permute.xlu1 %2139 }
 0x195   : > { %v2404_v18 = vsel %vm2372_vm12, %v2371_v45, %v2140_v51  ;;  %v2138_v39 = vpop.permute.xlu0 %2137 }
 0x196   : > { %v2854_v36 = vadd.f32 %v2853_v49, %v2823_v24  ;;  %v2402_v60 = vsel %vm2372_vm12, %v2369_v28, %v2138_v39  ;;  %v2785_v56 = vadd.f32 %v3387_v22, %v2784_v35 }
 0x197   : > { %3412 = vmatprep.mubr.msk.bf16.mxu1 %vm2425_vm13, %v2402_v60 }
 0x198   : > { %3413 = vmatmul.mubr.msk.bf16.gmra.mrb[12].mxu1 %vm2425_vm13, %v2404_v18  ;;  %v2855_v40 = vadd.f32 %v2854_v36, %v2824_v37 }
 0x1ae   : > { %v3390_v34 = vpop.f32.mrb[4].mxu0 }
 0x1af   : > { %v2512_v27 = vpop.f32.mrb[5].mxu0  ;;  %v2827_v11 = vmul.f32 %v3390_v34, %v3390_v34 }
 0x1b0   : > { %v2786_v16 = vadd.f32 %v2785_v56, %v2512_v27  ;;  %v2825_v41 = vmul.f32 %v2512_v27, %v2512_v27  ;;  %v3391_v15 = vpop.f32.mrb[6].mxu0 }
 0x1b1   : > { %v3282_v21 = vpack.c.bf16 %v3391_v15, %v3390_v34  ;;  %v2515_v31 = vpop.f32.mrb[7].mxu0  ;;  %v2828_v9 = vmul.f32 %v3391_v15, %v3391_v15 }
 0x1b2   : > { %v2856_v55 = vadd.f32 %v2855_v40, %v2825_v41  ;;  %v3277_v4 = vpack.c.bf16 %v2515_v31, %v2512_v27  ;;  %v2787_v47 = vadd.f32 %v2786_v16, %v2515_v31  ;;  %v2826_v7 = vmul.f32 %v2515_v31, %v2515_v31 }
 0x1b3   : > { %3346 = vst [vmem:[%s4727_s24 + $0x18] sm:$0xff] %v3282_v21  }
 0x1b4   : > { %3345 = vst [vmem:[%s4727_s24 + $0x10] sm:$0xff] %v3277_v4   ;;  %v2788_v50 = vadd.f32 %v3390_v34, %v2787_v47  ;;  %v2857_v2 = vadd.f32 %v2856_v55, %v2826_v7 }
 0x1b6   : > { %v2858_v13 = vadd.f32 %v2857_v2, %v2827_v11  ;;  %v2789_v33 = vadd.f32 %v3391_v15, %v2788_v50 }
 0x1b8   : > { %v2859_v8 = vadd.f32 %v2858_v13, %v2828_v9 }
 0x1ce   : > { %v3394_v6 = vpop.f32.mrb[8].mxu0 }
 0x1cf   : > { %v2528_v29 = vpop.f32.mrb[9].mxu0  ;;  %v2831_v19 = vmul.f32 %v3394_v6, %v3394_v6 }
 0x1d0   : > { %v2790_v57 = vadd.f32 %v2789_v33, %v2528_v29  ;;  %v2829_v32 = vmul.f32 %v2528_v29, %v2528_v29  ;;  %v3395_v30 = vpop.f32.mrb[10].mxu0 }
 0x1d1   : > { %v3292_v20 = vpack.c.bf16 %v3395_v30, %v3394_v6  ;;  %v2531_v53 = vpop.f32.mrb[11].mxu0  ;;  %v2832_v54 = vmul.f32 %v3395_v30, %v3395_v30 }
 0x1d2   : > { %v2860_v25 = vadd.f32 %v2859_v8, %v2829_v32  ;;  %v3287_v10 = vpack.c.bf16 %v2531_v53, %v2528_v29  ;;  %v2791_v52 = vadd.f32 %v2790_v57, %v2531_v53  ;;  %v2830_v46 = vmul.f32 %v2531_v53, %v2531_v53 }
 0x1d3   : > { %3348 = vst [vmem:[%s4727_s24 + $0x28] sm:$0xff] %v3292_v20  }
 0x1d4   : > { %3347 = vst [vmem:[%s4727_s24 + $0x20] sm:$0xff] %v3287_v10   ;;  %v2792_v42 = vadd.f32 %v3394_v6, %v2791_v52  ;;  %v2861_v1 = vadd.f32 %v2860_v25, %v2830_v46 }
 0x1d6   : > { %v2862_v43 = vadd.f32 %v2861_v1, %v2831_v19  ;;  %v2793_v17 = vadd.f32 %v3395_v30, %v2792_v42 }
 0x1d8   : > { %v2863_v3 = vadd.f32 %v2862_v43, %v2832_v54 }
 0x1ee   : > { %v3398_v58 = vpop.f32.mrb[12].mxu0 }
 0x1ef   : > { %v2544_v0 = vpop.f32.mrb[13].mxu0  ;;  %v2835_v23 = vmul.f32 %v3398_v58, %v3398_v58 }
 0x1f0   : > { %v2794_v22 = vadd.f32 %v2793_v17, %v2544_v0  ;;  %v2833_v12 = vmul.f32 %v2544_v0, %v2544_v0  ;;  %v3399_v26 = vpop.f32.mrb[14].mxu0 }
 0x1f1   : > { %v3302_v48 = vpack.c.bf16 %v3399_v26, %v3398_v58  ;;  %v2547_v5 = vpop.f32.mrb[15].mxu0  ;;  %v2836_v38 = vmul.f32 %v3399_v26, %v3399_v26 }
 0x1f2   : > { %v2864_v44 = vadd.f32 %v2863_v3, %v2833_v12  ;;  %v3297_v14 = vpack.c.bf16 %v2547_v5, %v2544_v0  ;;  %v2795_v59 = vadd.f32 %v2794_v22, %v2547_v5  ;;  %v2834_v63 = vmul.f32 %v2547_v5, %v2547_v5 }
 0x1f3   : > { %3350 = vst [vmem:[%s4727_s24 + $0x38] sm:$0xff] %v3302_v48  }
 0x1f4   : > { %3349 = vst [vmem:[%s4727_s24 + $0x30] sm:$0xff] %v3297_v14   ;;  %v2796_v62 = vadd.f32 %v3398_v58, %v2795_v59  ;;  %v2865_v61 = vadd.f32 %v2864_v44, %v2834_v63 }
 0x1f6   : > { %v2866_v24 = vadd.f32 %v2865_v61, %v2835_v23  ;;  %v2797_v45 = vadd.f32 %v3399_v26, %v2796_v62 }
 0x1f8   : > { %v2867_v35 = vadd.f32 %v2866_v24, %v2836_v38 }
 0x20e   : > { %v3402_v49 = vpop.f32.mrb[0].mxu1 }
 0x20f   : > { %v2560_v51 = vpop.f32.mrb[1].mxu1  ;;  %v2839_v27 = vmul.f32 %v3402_v49, %v3402_v49 }
 0x210   : > { %v2798_v28 = vadd.f32 %v2797_v45, %v2560_v51  ;;  %v2837_v18 = vmul.f32 %v2560_v51, %v2560_v51  ;;  %v3403_v39 = vpop.f32.mrb[2].mxu1 }
 0x211   : > { %v3312_v37 = vpack.c.bf16 %v3403_v39, %v3402_v49  ;;  %v2563_v36 = vpop.f32.mrb[3].mxu1  ;;  %v2840_v15 = vmul.f32 %v3403_v39, %v3403_v39 }
 0x212   : > { %v2868_v60 = vadd.f32 %v2867_v35, %v2837_v18  ;;  %v3307_v56 = vpack.c.bf16 %v2563_v36, %v2560_v51  ;;  %v2799_v40 = vadd.f32 %v2798_v28, %v2563_v36  ;;  %v2838_v34 = vmul.f32 %v2563_v36, %v2563_v36 }
 0x213   : > { %3352 = vst [vmem:[%s4727_s24 + $0x48] sm:$0xff] %v3312_v37  }
 0x214   : > { %3351 = vst [vmem:[%s4727_s24 + $0x40] sm:$0xff] %v3307_v56   ;;  %v2800_v16 = vadd.f32 %v3402_v49, %v2799_v40  ;;  %v2869_v41 = vadd.f32 %v2868_v60, %v2838_v34 }
 0x216   : > { %v2870_v21 = vadd.f32 %v2869_v41, %v2839_v27  ;;  %v2801_v31 = vadd.f32 %v3403_v39, %v2800_v16 }
 0x218   : > { %v2871_v55 = vadd.f32 %v2870_v21, %v2840_v15 }
 0x22e   : > { %v3406_v4 = vpop.f32.mrb[4].mxu1 }
 0x22f   : > { %v2576_v47 = vpop.f32.mrb[5].mxu1  ;;  %v2843_v29 = vmul.f32 %v3406_v4, %v3406_v4 }
 0x230   : > { %v2802_v7 = vadd.f32 %v2801_v31, %v2576_v47  ;;  %v2841_v11 = vmul.f32 %v2576_v47, %v2576_v47  ;;  %v3407_v50 = vpop.f32.mrb[6].mxu1 }
 0x231   : > { %v3322_v2 = vpack.c.bf16 %v3407_v50, %v3406_v4  ;;  %v2579_v9 = vpop.f32.mrb[7].mxu1  ;;  %v2844_v30 = vmul.f32 %v3407_v50, %v3407_v50 }
 0x232   : > { %v2872_v13 = vadd.f32 %v2871_v55, %v2841_v11  ;;  %v3317_v33 = vpack.c.bf16 %v2579_v9, %v2576_v47  ;;  %v2803_v8 = vadd.f32 %v2802_v7, %v2579_v9  ;;  %v2842_v6 = vmul.f32 %v2579_v9, %v2579_v9 }
 0x233   : > { %3354 = vst [vmem:[%s4727_s24 + $0x58] sm:$0xff] %v3322_v2  }
 0x234   : > { %3353 = vst [vmem:[%s4727_s24 + $0x50] sm:$0xff] %v3317_v33   ;;  %v2804_v57 = vadd.f32 %v3406_v4, %v2803_v8  ;;  %v2873_v32 = vadd.f32 %v2872_v13, %v2842_v6 }
 0x236   : > { %v2874_v20 = vadd.f32 %v2873_v32, %v2843_v29  ;;  %v2805_v53 = vadd.f32 %v3407_v50, %v2804_v57 }
 0x238   : > { %v2875_v25 = vadd.f32 %v2874_v20, %v2844_v30 }
 0x24e   : > { %v3410_v10 = vpop.f32.mrb[8].mxu1 }
 0x24f   : > { %v2592_v52 = vpop.f32.mrb[9].mxu1  ;;  %v2847_v0 = vmul.f32 %v3410_v10, %v3410_v10 }
 0x250   : > { %v2806_v46 = vadd.f32 %v2805_v53, %v2592_v52  ;;  %v2845_v19 = vmul.f32 %v2592_v52, %v2592_v52  ;;  %v3411_v42 = vpop.f32.mrb[10].mxu1 }
 0x251   : > { %v3332_v1 = vpack.c.bf16 %v3411_v42, %v3410_v10  ;;  %v2595_v54 = vpop.f32.mrb[11].mxu1  ;;  %v2848_v26 = vmul.f32 %v3411_v42, %v3411_v42 }
 0x252   : > { %v2876_v43 = vadd.f32 %v2875_v25, %v2845_v19  ;;  %v3327_v17 = vpack.c.bf16 %v2595_v54, %v2592_v52  ;;  %v2807_v3 = vadd.f32 %v2806_v46, %v2595_v54  ;;  %v2846_v58 = vmul.f32 %v2595_v54, %v2595_v54 }
 0x253   : > { %3356 = vst [vmem:[%s4727_s24 + $0x68] sm:$0xff] %v3332_v1  }
 0x254   : > { %3355 = vst [vmem:[%s4727_s24 + $0x60] sm:$0xff] %v3327_v17   ;;  %v2808_v22 = vadd.f32 %v3410_v10, %v2807_v3  ;;  %v2877_v12 = vadd.f32 %v2876_v43, %v2846_v58 }
 0x256   : > { %v2878_v48 = vadd.f32 %v2877_v12, %v2847_v0  ;;  %v2809_v5 = vadd.f32 %v3411_v42, %v2808_v22 }
 0x258   : > { %v2879_v44 = vadd.f32 %v2878_v48, %v2848_v26 }
 0x26b   : > { %v3414_v14 = vpop.f32.mrb[12].mxu1 }
 0x26c   : > { %v2608_v59 = vpop.f32.mrb[13].mxu1  ;;  %v2851_v51 = vmul.f32 %v3414_v14, %v3414_v14 }
 0x26d   : > { %v2810_v63 = vadd.f32 %v2809_v5, %v2608_v59  ;;  %v2849_v23 = vmul.f32 %v2608_v59, %v2608_v59  ;;  %v3415_v62 = vpop.f32.mrb[14].mxu1 }
 0x26e   : > { %v3342_v61 = vpack.c.bf16 %v3415_v62, %v3414_v14  ;;  %v2611_v38 = vpop.f32.mrb[15].mxu1  ;;  %v2852_v39 = vmul.f32 %v3415_v62, %v3415_v62 }
 0x26f   : > { %v2880_v24 = vadd.f32 %v2879_v44, %v2849_v23  ;;  %v3337_v45 = vpack.c.bf16 %v2611_v38, %v2608_v59  ;;  %v2811_v35 = vadd.f32 %v2810_v63, %v2611_v38  ;;  %v2850_v49 = vmul.f32 %v2611_v38, %v2611_v38 }
 0x270   : > { %3358 = vst [vmem:[%s4727_s24 + $0x78] sm:$0xff] %v3342_v61  }
 0x271   : > { %3357 = vst [vmem:[%s4727_s24 + $0x70] sm:$0xff] %v3337_v45   ;;  %v2812_v28 = vadd.f32 %v3414_v14, %v2811_v35  ;;  %v2881_v18 = vadd.f32 %v2880_v24, %v2850_v49 }
 0x273   : > { %v2813_v37 = vadd.f32 %v3415_v62, %v2812_v28  ;;  %v2882_v36 = vadd.f32 %v2881_v18, %v2851_v51 }
 0x275   : > { %v2814_v60 = vrot.slane %v2813_v37, 4  ;;  %v2883_v56 = vadd.f32 %v2882_v36, %v2852_v39 }
 0x277   : > { %v2815_v40 = vadd.f32 %v2814_v60, %v2813_v37  ;;  %v2884_v34 = vrot.slane %v2883_v56, 4 }
 0x279   : > { %v2816_v27 = vrot.slane %v2815_v40, 2  ;;  %v2885_v16 = vadd.f32 %v2884_v34, %v2883_v56 }
 0x27b   : > { %v2817_v41 = vadd.f32 %v2816_v27, %v2815_v40  ;;  %v2886_v15 = vrot.slane %v2885_v16, 2 }
 0x27d   : > { %v2818_v21 = vrot.slane %v2817_v41, 1  ;;  %v2887_v31 = vadd.f32 %v2886_v15, %v2885_v16 }
 0x27f   : > { %v2819_v55 = vadd.f32 %v2818_v21, %v2817_v41  ;;  %v2888_v4 = vrot.slane %v2887_v31, 1 }
 0x281   : > { %2820 = vst [vmem:[%s327_s28] sm:$0x1] %v2819_v55  ;;  %v2889_v47 = vadd.f32 %v2888_v4, %v2887_v31 }
 0x283   : > { %2890 = vst [vmem:[%s327_s28 + $0x1] sm:$0x1] %v2889_v47 }
 0x284 PF: > { %s15_s17 = sadd.s32 1, %s3620_s17   ;;  %s4773_s15 = smov %s3616_s16 }
 0x285   : > { %p12_p6 = scmp.ge.s32.totalorder %s15_s17, 4   ;;  %s4774_s16 = smov %s4776_s18 }
 0x287   :  { %14 = sbr.rel (!%p12_p6) target bundleno = 2 (0x2), region = 80 }

</bundles_post_ra>
